<compile_context>
chip_gen: v6e
topology: v6e:2x2x1
jax: 0.10.0
libtpu: 0.0.40
codegen_flags: <defaults>
</compile_context>

<pallas_src>
import functools
import math

import jax
import jax.numpy as jnp
from jax import lax
from jax.experimental import pallas as pl
from jax.experimental.pallas import tpu as pltpu


def _vmem_limit_bytes():
    """~75% of the physical per-core VMEM (generation-aware)."""
    try:
        cap = pltpu.get_tpu_info().vmem_capacity_bytes
        return int(cap) * 3 // 4
    except Exception:
        return 48 * 1024 * 1024  # conservative fallback (fits v7x's 64 MiB)


def _pick_query_tile(seq_len):
    """Query-row tile: 256 on 256-wide-MXU parts (v6e/v7x), 128 on v5e."""
    if seq_len <= 128:
        return seq_len
    try:
        kind = jax.devices()[0].device_kind.lower()
        is_v5e = ("v5 lite" in kind) or ("v5e" in kind) or ("v5litepod" in kind)
    except Exception:
        is_v5e = False
    if (not is_v5e) and seq_len % 256 == 0:
        return 256
    if seq_len % 128 == 0:
        return 128
    return seq_len  # single full-extent tile


# ---------------------------------------------------------------------------
# Stage 1 (gridless, runs once): self-attn K|V projection, 2-layer GCN, and
# the cross-attn K|V projection fused onto the GCN output.
# TODO(synk): GCNModel internals not provided; assumed Kipf-style GCN layers.
# ---------------------------------------------------------------------------
def stage1_kernel(hc_ref, adj_ref, gw1_ref, gb1_ref, gw2_ref, gb2_ref,
                  ha_ref, skvw_ref, skvb_ref, ckvw_ref, ckvb_ref,
                  kvs_ref, kvc_ref):
    bf16 = jnp.bfloat16

    # self-attention K|V over h_a (bias folded into the stored tensor)
    kvs = jnp.dot(ha_ref[...], skvw_ref[...],
                  preferred_element_type=jnp.float32)
    kvs_ref[...] = (kvs + skvb_ref[...]).astype(bf16)

    # 2-layer GCN: x = relu( Â (x W) + b )
    x = hc_ref[...]
    adj = adj_ref[...]
    for w_ref, b_ref in ((gw1_ref, gb1_ref), (gw2_ref, gb2_ref)):
        xw = jnp.dot(x, w_ref[...], preferred_element_type=jnp.float32)
        y = jnp.dot(adj, xw.astype(bf16), preferred_element_type=jnp.float32)
        x = jnp.maximum(y + b_ref[...], 0.0).astype(bf16)

    # cross-attention K|V over the GCN output (fused: gcn_out never hits HBM)
    kvc = jnp.dot(x, ckvw_ref[...], preferred_element_type=jnp.float32)
    kvc_ref[...] = (kvc + ckvb_ref[...]).astype(bf16)


# ---------------------------------------------------------------------------
# Stage 2: self-attn + cross-attn (precomputed K|V) + residual + LayerNorm
# ---------------------------------------------------------------------------
def _softmax_last(s):
    m = jnp.max(s, axis=-1, keepdims=True)
    p = jnp.exp(s - m)
    return p * pl.reciprocal(jnp.sum(p, axis=-1, keepdims=True), approx=True)


def _attention(q_in, kv, wq, bq, wo, bo, num_heads):
    """MHA with precomputed fused K|V (bias already folded), eval mode.

    wq/bq already contain the 1/sqrt(head_dim) softmax scale.  The head axis
    is carried as an einsum batch dim, so no explicit head transposes.
    """
    tq, H = q_in.shape
    s_kv = kv.shape[0]
    hd = H // num_heads
    bf16 = jnp.bfloat16

    q = jnp.dot(q_in.astype(bf16), wq, preferred_element_type=jnp.float32) + bq
    qh = q.astype(bf16).reshape(tq, num_heads, hd)
    kh = kv[:, :H].reshape(s_kv, num_heads, hd)
    vh = kv[:, H:].reshape(s_kv, num_heads, hd)

    scores = jnp.einsum('qhd,khd->hqk', qh, kh,
                        preferred_element_type=jnp.float32)
    p = _softmax_last(scores)
    o = jnp.einsum('hqk,khd->qhd', p.astype(bf16), vh,
                   preferred_element_type=jnp.float32).reshape(tq, H)
    return jnp.dot(o.astype(bf16), wo, preferred_element_type=jnp.float32) + bo


def attn_kernel(num_heads,
                hq_ref, kvs_ref, kvc_ref,
                sqw_ref, sqb_ref, sow_ref, sob_ref,
                cqw_ref, cqb_ref, cow_ref, cob_ref,
                lng_ref, lnb_ref,
                out_ref):
    # self attention: queries = this tile of h_a, K/V = precomputed over h_a
    q_self = _attention(hq_ref[...], kvs_ref[...],
                        sqw_ref[...], sqb_ref[...], sow_ref[...], sob_ref[...],
                        num_heads)

    # cross attention: queries = q_self, K/V = precomputed over the GCN output
    # TODO(synk): Cross_Transformer internals not provided; assumed MHA + out proj.
    cross = _attention(q_self, kvc_ref[...],
                       cqw_ref[...], cqb_ref[...], cow_ref[...], cob_ref[...],
                       num_heads)

    # residual + LayerNorm (dropout is identity in eval mode), f32 math
    y = q_self + cross
    mean = jnp.mean(y, axis=-1, keepdims=True)
    var = jnp.mean(jnp.square(y - mean), axis=-1, keepdims=True)
    y = (y - mean) * lax.rsqrt(var + 1e-5)
    out_ref[...] = (y * lng_ref[...] + lnb_ref[...]).astype(out_ref.dtype)


# ---------------------------------------------------------------------------
# Parameters (separate q/k/v weights; wrapper fuses / scales / casts them)
# ---------------------------------------------------------------------------
def init_params(key, H):
    keys = jax.random.split(key, 10)

    def w(k):
        return jax.random.normal(k, (H, H), jnp.float32) * 0.02

    def b():
        return jnp.zeros((1, H), jnp.float32)

    return (
        # GCN layer 1, layer 2
        w(keys[0]), b(), w(keys[1]), b(),
        # self-attention q, k, v, out  (weights stored as (in, out))
        w(keys[2]), b(), w(keys[3]), b(), w(keys[4]), b(), w(keys[5]), b(),
        # cross-attention q, k, v, out
        w(keys[6]), b(), w(keys[7]), b(), w(keys[8]), b(), w(keys[9]), b(),
        # LayerNorm gamma / beta
        jnp.ones((1, H), jnp.float32), jnp.zeros((1, H), jnp.float32),
    )


# ---------------------------------------------------------------------------
# Forward wrapper
# ---------------------------------------------------------------------------
def s2a_forward(h_a, h_s, text_graph, params, num_heads):
    S, H = h_a.shape
    assert H % num_heads == 0
    bf16 = jnp.bfloat16
    vmem_limit = _vmem_limit_bytes()
    (gw1, gb1, gw2, gb2,
     sqw, sqb, skw, skb, svw, svb, sow, sob,
     cqw, cqb, ckw, ckb, cvw, cvb, cow, cob,
     lng, lnb) = params

    # glue: torch.cat([h_a, h_s], -1) then MaxPool1d(kernel=2, stride=2)
    # over the feature axis -> (S, H)
    h_c = jnp.concatenate([h_a, h_s], axis=-1)
    h_concat = jnp.max(h_c.reshape(S, H, 2), axis=-1)

    # glue: symmetric-normalized adjacency with self loops for the GCN
    a_hat = text_graph.astype(jnp.float32) + jnp.eye(S, dtype=jnp.float32)
    d_inv_sqrt = 1.0 / jnp.sqrt(jnp.sum(a_hat, axis=-1))
    adj = a_hat * d_inv_sqrt[:, None] * d_inv_sqrt[None, :]

    # weight prep: fold softmax scale into Q, fuse K|V, cast weights to bf16
    scale = 1.0 / math.sqrt(H // num_heads)
    sqw_s, sqb_s = sqw * scale, sqb * scale
    cqw_s, cqb_s = cqw * scale, cqb * scale
    skvw = jnp.concatenate([skw, svw], axis=1)   # (H, 2H)
    skvb = jnp.concatenate([skb, svb], axis=1)   # (1, 2H)
    ckvw = jnp.concatenate([ckw, cvw], axis=1)
    ckvb = jnp.concatenate([ckb, cvb], axis=1)

    h_a_bf = h_a.astype(bf16)

    # ---- stage 1: GCN + hoisted K|V projections (single launch) -------------
    kv_self, kv_cross = pl.pallas_call(
        stage1_kernel,
        out_shape=(jax.ShapeDtypeStruct((S, 2 * H), bf16),
                   jax.ShapeDtypeStruct((S, 2 * H), bf16)),
        in_specs=[pl.BlockSpec(memory_space=pltpu.MemorySpace.VMEM)] * 11,
        out_specs=(pl.BlockSpec(memory_space=pltpu.MemorySpace.VMEM),) * 2,
        compiler_params=pltpu.CompilerParams(vmem_limit_bytes=vmem_limit),
    )(h_concat.astype(bf16), adj.astype(bf16),
      gw1.astype(bf16), gb1, gw2.astype(bf16), gb2,
      h_a_bf, skvw.astype(bf16), skvb, ckvw.astype(bf16), ckvb)

    # ---- stage 2: attention kernel, grid over query-row tiles ---------------
    TQ = _pick_query_tile(S)
    assert S % TQ == 0, "sequence length must be a multiple of the query tile"
    grid = (S // TQ,)
    # TODO(synk): if the production shape has S <= 128 (grid collapses to 1),
    # split the grid over head groups so both v7x TensorCores stay busy.

    def inv_spec(shape):
        # grid-invariant input: constant index_map, single-buffered
        n = len(shape)
        return pl.BlockSpec(shape, lambda i: (0,) * n,
                            pipeline_mode=pl.Buffered(1))

    in_specs = [
        pl.BlockSpec((TQ, H), lambda i: (i, 0)),     # h_a query tile
        inv_spec((S, 2 * H)),                        # kv_self (stationary)
        inv_spec((S, 2 * H)),                        # kv_cross (stationary)
        inv_spec((H, H)), inv_spec((1, H)),          # self Q (pre-scaled)
        inv_spec((H, H)), inv_spec((1, H)),          # self out proj
        inv_spec((H, H)), inv_spec((1, H)),          # cross Q (pre-scaled)
        inv_spec((H, H)), inv_spec((1, H)),          # cross out proj
        inv_spec((1, H)), inv_spec((1, H)),          # LayerNorm gamma/beta
    ]

    return pl.pallas_call(
        functools.partial(attn_kernel, num_heads),
        out_shape=jax.ShapeDtypeStruct((S, H), jnp.float32),
        grid=grid,
        in_specs=in_specs,
        out_specs=pl.BlockSpec((TQ, H), lambda i: (i, 0)),
        compiler_params=pltpu.CompilerParams(
            dimension_semantics=("parallel",),
            vmem_limit_bytes=vmem_limit),
    )(h_a_bf, kv_self, kv_cross,
      sqw_s.astype(bf16), sqb_s, sow.astype(bf16), sob,
      cqw_s.astype(bf16), cqb_s, cow.astype(bf16), cob,
      lng, lnb)


if __name__ == "__main__":
    SEQ, HID, NHEADS = 8, 32, 4   # small stand-ins for (seq, 768, 12)

    key = jax.random.PRNGKey(0)
    k_a, k_s, k_g, k_p = jax.random.split(key, 4)

    h_a = jax.random.normal(k_a, (SEQ, HID), jnp.float32)
    h_s = jax.random.normal(k_s, (SEQ, HID), jnp.float32)
    g = jax.random.bernoulli(k_g, 0.4, (SEQ, SEQ))
    text_graph = (g | g.T).astype(jnp.float32)   # symmetric 0/1 text graph

    params = init_params(k_p, HID)

    fwd = jax.jit(functools.partial(s2a_forward, num_heads=NHEADS))
    h_ae = fwd(h_a, h_s, text_graph, params)
    h_ae = jax.block_until_ready(h_ae)

    assert h_ae.shape == (SEQ, HID)
    assert bool(jnp.all(jnp.isfinite(h_ae)))
    print("KERNEL_OK")
</pallas_src>

<mosaic_0001>
module attributes {stable_mosaic.version = 11 : i64} {
  func.func @attn_kernel(%arg0: i32, %arg1: memref<8x32xbf16, #tpu.memory_space<vmem>>, %arg2: memref<8x64xbf16, #tpu.memory_space<vmem>>, %arg3: memref<8x64xbf16, #tpu.memory_space<vmem>>, %arg4: memref<32x32xbf16, #tpu.memory_space<vmem>>, %arg5: memref<1x32xf32, #tpu.memory_space<vmem>>, %arg6: memref<32x32xbf16, #tpu.memory_space<vmem>>, %arg7: memref<1x32xf32, #tpu.memory_space<vmem>>, %arg8: memref<32x32xbf16, #tpu.memory_space<vmem>>, %arg9: memref<1x32xf32, #tpu.memory_space<vmem>>, %arg10: memref<32x32xbf16, #tpu.memory_space<vmem>>, %arg11: memref<1x32xf32, #tpu.memory_space<vmem>>, %arg12: memref<1x32xf32, #tpu.memory_space<vmem>>, %arg13: memref<1x32xf32, #tpu.memory_space<vmem>>, %arg14: memref<8x32xf32, #tpu.memory_space<vmem>>) attributes {dimension_semantics = [#tpu.dimension_semantics<parallel>], iteration_bounds = array<i64: 1>, scalar_prefetch = 0 : i64, scratch_operands = 0 : i64, tpu.core_type = #tpu.core_type<tc>, window_params = [{transform_indices = @transform_0, window_bounds = array<i64: 8, 32>}, {pipeline_mode = #tpu.pipeline_mode<synchronous>, transform_indices = @transform_1, window_bounds = array<i64: 8, 64>}, {pipeline_mode = #tpu.pipeline_mode<synchronous>, transform_indices = @transform_2, window_bounds = array<i64: 8, 64>}, {pipeline_mode = #tpu.pipeline_mode<synchronous>, transform_indices = @transform_3, window_bounds = array<i64: 32, 32>}, {pipeline_mode = #tpu.pipeline_mode<synchronous>, transform_indices = @transform_4, window_bounds = array<i64: 1, 32>}, {pipeline_mode = #tpu.pipeline_mode<synchronous>, transform_indices = @transform_5, window_bounds = array<i64: 32, 32>}, {pipeline_mode = #tpu.pipeline_mode<synchronous>, transform_indices = @transform_6, window_bounds = array<i64: 1, 32>}, {pipeline_mode = #tpu.pipeline_mode<synchronous>, transform_indices = @transform_7, window_bounds = array<i64: 32, 32>}, {pipeline_mode = #tpu.pipeline_mode<synchronous>, transform_indices = @transform_8, window_bounds = array<i64: 1, 32>}, {pipeline_mode = #tpu.pipeline_mode<synchronous>, transform_indices = @transform_9, window_bounds = array<i64: 32, 32>}, {pipeline_mode = #tpu.pipeline_mode<synchronous>, transform_indices = @transform_10, window_bounds = array<i64: 1, 32>}, {pipeline_mode = #tpu.pipeline_mode<synchronous>, transform_indices = @transform_11, window_bounds = array<i64: 1, 32>}, {pipeline_mode = #tpu.pipeline_mode<synchronous>, transform_indices = @transform_12, window_bounds = array<i64: 1, 32>}, {transform_indices = @transform_13, window_bounds = array<i64: 8, 32>}]} {
    %c0 = arith.constant 0 : index
    %c0_0 = arith.constant 0 : index
    %0 = vector.load %arg1[%c0, %c0_0] : memref<8x32xbf16, #tpu.memory_space<vmem>>, vector<8x32xbf16>
    %c0_1 = arith.constant 0 : index
    %c0_2 = arith.constant 0 : index
    %1 = vector.load %arg2[%c0_1, %c0_2] : memref<8x64xbf16, #tpu.memory_space<vmem>>, vector<8x64xbf16>
    %c0_3 = arith.constant 0 : index
    %c0_4 = arith.constant 0 : index
    %2 = vector.load %arg4[%c0_3, %c0_4] : memref<32x32xbf16, #tpu.memory_space<vmem>>, vector<32x32xbf16>
    %c0_5 = arith.constant 0 : index
    %c0_6 = arith.constant 0 : index
    %3 = vector.load %arg5[%c0_5, %c0_6] : memref<1x32xf32, #tpu.memory_space<vmem>>, vector<1x32xf32>
    %c0_7 = arith.constant 0 : index
    %c0_8 = arith.constant 0 : index
    %4 = vector.load %arg6[%c0_7, %c0_8] : memref<32x32xbf16, #tpu.memory_space<vmem>>, vector<32x32xbf16>
    %c0_9 = arith.constant 0 : index
    %c0_10 = arith.constant 0 : index
    %5 = vector.load %arg7[%c0_9, %c0_10] : memref<1x32xf32, #tpu.memory_space<vmem>>, vector<1x32xf32>
    %cst = arith.constant dense<0.000000e+00> : vector<8x32xf32>
    %6 = tpu.matmul %0, %2, %cst {dimension_numbers = #tpu.dot_dimension_numbers<[1], [0], [0], [1], [0, 0, 1, 1], [], []>} : vector<8x32xbf16>, vector<32x32xbf16>, vector<8x32xf32> -> vector<8x32xf32>
    %7 = vector.broadcast %3 : vector<1x32xf32> to vector<8x32xf32>
    %8 = arith.addf %6, %7 : vector<8x32xf32>
    %9 = arith.truncf %8 : vector<8x32xf32> to vector<8x32xbf16>
    %10 = vector.shape_cast %9 : vector<8x32xbf16> to vector<8x4x8xbf16>
    %11 = vector.extract_strided_slice %1 {offsets = [0, 0], sizes = [8, 32], strides = [1, 1]} : vector<8x64xbf16> to vector<8x32xbf16>
    %12 = vector.shape_cast %11 : vector<8x32xbf16> to vector<8x4x8xbf16>
    %13 = vector.extract_strided_slice %1 {offsets = [0, 32], sizes = [8, 32], strides = [1, 1]} : vector<8x64xbf16> to vector<8x32xbf16>
    %14 = vector.shape_cast %13 : vector<8x32xbf16> to vector<8x4x8xbf16>
    "tpu.trace_start"() <{level = 10 : i32, message = "qhd,khd->hqk"}> : () -> ()
    %cst_11 = arith.constant dense<0.000000e+00> : vector<4x8x8xf32>
    %15 = tpu.matmul %10, %12, %cst_11 {dimension_numbers = #tpu.dot_dimension_numbers<[2], [2], [0], [0], [0, 1, 0, 0, 1, 0], [1], [1]>} : vector<8x4x8xbf16>, vector<8x4x8xbf16>, vector<4x8x8xf32> -> vector<4x8x8xf32>
    "tpu.trace_stop"() : () -> ()
    %cst_12 = arith.constant dense<0xFF800000> : vector<4x8xf32>
    %16 = vector.multi_reduction <maximumf>, %15, %cst_12 [2] : vector<4x8x8xf32> to vector<4x8xf32>
    %17 = vector.shape_cast %16 : vector<4x8xf32> to vector<4x8x1xf32>
    %18 = vector.broadcast %17 : vector<4x8x1xf32> to vector<4x8x8xf32>
    %19 = arith.subf %15, %18 : vector<4x8x8xf32>
    %20 = math.exp %19 : vector<4x8x8xf32>
    %cst_13 = arith.constant dense<0.000000e+00> : vector<4x8xf32>
    %21 = vector.multi_reduction <add>, %20, %cst_13 [2] : vector<4x8x8xf32> to vector<4x8xf32>
    %22 = vector.shape_cast %21 : vector<4x8xf32> to vector<4x8x1xf32>
    %23 = tpu.reciprocal %22 {approx = true} : vector<4x8x1xf32> -> vector<4x8x1xf32>
    %24 = vector.broadcast %23 : vector<4x8x1xf32> to vector<4x8x8xf32>
    %25 = arith.mulf %20, %24 : vector<4x8x8xf32>
    %26 = arith.truncf %25 : vector<4x8x8xf32> to vector<4x8x8xbf16>
    "tpu.trace_start"() <{level = 10 : i32, message = "hqk,khd->qhd"}> : () -> ()
    %cst_14 = arith.constant dense<0.000000e+00> : vector<4x8x8xf32>
    %27 = tpu.matmul %14, %26, %cst_14 {dimension_numbers = #tpu.dot_dimension_numbers<[0], [2], [2], [1], [0, 1, 0, 2, 1, 1], [1], [0]>} : vector<8x4x8xbf16>, vector<4x8x8xbf16>, vector<4x8x8xf32> -> vector<4x8x8xf32>
    %28 = tpu.transpose %27, [2, 0, 1] : vector<4x8x8xf32> -> vector<8x4x8xf32>
    "tpu.trace_stop"() : () -> ()
    %29 = vector.shape_cast %28 : vector<8x4x8xf32> to vector<8x32xf32>
    %30 = arith.truncf %29 : vector<8x32xf32> to vector<8x32xbf16>
    %cst_15 = arith.constant dense<0.000000e+00> : vector<8x32xf32>
    %31 = tpu.matmul %30, %4, %cst_15 {dimension_numbers = #tpu.dot_dimension_numbers<[1], [0], [0], [1], [0, 0, 1, 1], [], []>} : vector<8x32xbf16>, vector<32x32xbf16>, vector<8x32xf32> -> vector<8x32xf32>
    %32 = vector.broadcast %5 : vector<1x32xf32> to vector<8x32xf32>
    %33 = arith.addf %31, %32 : vector<8x32xf32>
    %c0_16 = arith.constant 0 : index
    %c0_17 = arith.constant 0 : index
    %34 = vector.load %arg3[%c0_16, %c0_17] : memref<8x64xbf16, #tpu.memory_space<vmem>>, vector<8x64xbf16>
    %c0_18 = arith.constant 0 : index
    %c0_19 = arith.constant 0 : index
    %35 = vector.load %arg8[%c0_18, %c0_19] : memref<32x32xbf16, #tpu.memory_space<vmem>>, vector<32x32xbf16>
    %c0_20 = arith.constant 0 : index
    %c0_21 = arith.constant 0 : index
    %36 = vector.load %arg9[%c0_20, %c0_21] : memref<1x32xf32, #tpu.memory_space<vmem>>, vector<1x32xf32>
    %c0_22 = arith.constant 0 : index
    %c0_23 = arith.constant 0 : index
    %37 = vector.load %arg10[%c0_22, %c0_23] : memref<32x32xbf16, #tpu.memory_space<vmem>>, vector<32x32xbf16>
    %c0_24 = arith.constant 0 : index
    %c0_25 = arith.constant 0 : index
    %38 = vector.load %arg11[%c0_24, %c0_25] : memref<1x32xf32, #tpu.memory_space<vmem>>, vector<1x32xf32>
    %39 = arith.truncf %33 : vector<8x32xf32> to vector<8x32xbf16>
    %cst_26 = arith.constant dense<0.000000e+00> : vector<8x32xf32>
    %40 = tpu.matmul %39, %35, %cst_26 {dimension_numbers = #tpu.dot_dimension_numbers<[1], [0], [0], [1], [0, 0, 1, 1], [], []>} : vector<8x32xbf16>, vector<32x32xbf16>, vector<8x32xf32> -> vector<8x32xf32>
    %41 = vector.broadcast %36 : vector<1x32xf32> to vector<8x32xf32>
    %42 = arith.addf %40, %41 : vector<8x32xf32>
    %43 = arith.truncf %42 : vector<8x32xf32> to vector<8x32xbf16>
    %44 = vector.shape_cast %43 : vector<8x32xbf16> to vector<8x4x8xbf16>
    %45 = vector.extract_strided_slice %34 {offsets = [0, 0], sizes = [8, 32], strides = [1, 1]} : vector<8x64xbf16> to vector<8x32xbf16>
    %46 = vector.shape_cast %45 : vector<8x32xbf16> to vector<8x4x8xbf16>
    %47 = vector.extract_strided_slice %34 {offsets = [0, 32], sizes = [8, 32], strides = [1, 1]} : vector<8x64xbf16> to vector<8x32xbf16>
    %48 = vector.shape_cast %47 : vector<8x32xbf16> to vector<8x4x8xbf16>
    "tpu.trace_start"() <{level = 10 : i32, message = "qhd,khd->hqk"}> : () -> ()
    %cst_27 = arith.constant dense<0.000000e+00> : vector<4x8x8xf32>
    %49 = tpu.matmul %44, %46, %cst_27 {dimension_numbers = #tpu.dot_dimension_numbers<[2], [2], [0], [0], [0, 1, 0, 0, 1, 0], [1], [1]>} : vector<8x4x8xbf16>, vector<8x4x8xbf16>, vector<4x8x8xf32> -> vector<4x8x8xf32>
    "tpu.trace_stop"() : () -> ()
    %cst_28 = arith.constant dense<0xFF800000> : vector<4x8xf32>
    %50 = vector.multi_reduction <maximumf>, %49, %cst_28 [2] : vector<4x8x8xf32> to vector<4x8xf32>
    %51 = vector.shape_cast %50 : vector<4x8xf32> to vector<4x8x1xf32>
    %52 = vector.broadcast %51 : vector<4x8x1xf32> to vector<4x8x8xf32>
    %53 = arith.subf %49, %52 : vector<4x8x8xf32>
    %54 = math.exp %53 : vector<4x8x8xf32>
    %cst_29 = arith.constant dense<0.000000e+00> : vector<4x8xf32>
    %55 = vector.multi_reduction <add>, %54, %cst_29 [2] : vector<4x8x8xf32> to vector<4x8xf32>
    %56 = vector.shape_cast %55 : vector<4x8xf32> to vector<4x8x1xf32>
    %57 = tpu.reciprocal %56 {approx = true} : vector<4x8x1xf32> -> vector<4x8x1xf32>
    %58 = vector.broadcast %57 : vector<4x8x1xf32> to vector<4x8x8xf32>
    %59 = arith.mulf %54, %58 : vector<4x8x8xf32>
    %60 = arith.truncf %59 : vector<4x8x8xf32> to vector<4x8x8xbf16>
    "tpu.trace_start"() <{level = 10 : i32, message = "hqk,khd->qhd"}> : () -> ()
    %cst_30 = arith.constant dense<0.000000e+00> : vector<4x8x8xf32>
    %61 = tpu.matmul %48, %60, %cst_30 {dimension_numbers = #tpu.dot_dimension_numbers<[0], [2], [2], [1], [0, 1, 0, 2, 1, 1], [1], [0]>} : vector<8x4x8xbf16>, vector<4x8x8xbf16>, vector<4x8x8xf32> -> vector<4x8x8xf32>
    %62 = tpu.transpose %61, [2, 0, 1] : vector<4x8x8xf32> -> vector<8x4x8xf32>
    "tpu.trace_stop"() : () -> ()
    %63 = vector.shape_cast %62 : vector<8x4x8xf32> to vector<8x32xf32>
    %64 = arith.truncf %63 : vector<8x32xf32> to vector<8x32xbf16>
    %cst_31 = arith.constant dense<0.000000e+00> : vector<8x32xf32>
    %65 = tpu.matmul %64, %37, %cst_31 {dimension_numbers = #tpu.dot_dimension_numbers<[1], [0], [0], [1], [0, 0, 1, 1], [], []>} : vector<8x32xbf16>, vector<32x32xbf16>, vector<8x32xf32> -> vector<8x32xf32>
    %66 = vector.broadcast %38 : vector<1x32xf32> to vector<8x32xf32>
    %67 = arith.addf %65, %66 : vector<8x32xf32>
    %68 = arith.addf %33, %67 : vector<8x32xf32>
    %cst_32 = arith.constant dense<0.000000e+00> : vector<8xf32>
    %69 = vector.multi_reduction <add>, %68, %cst_32 [1] : vector<8x32xf32> to vector<8xf32>
    %70 = vector.shape_cast %69 : vector<8xf32> to vector<8x1xf32>
    %cst_33 = arith.constant 3.200000e+01 : f32
    %71 = vector.broadcast %cst_33 : f32 to vector<8x1xf32>
    %72 = arith.divf %70, %71 : vector<8x1xf32>
    %73 = vector.broadcast %72 : vector<8x1xf32> to vector<8x32xf32>
    %74 = arith.subf %68, %73 : vector<8x32xf32>
    %75 = arith.mulf %74, %74 : vector<8x32xf32>
    %cst_34 = arith.constant dense<0.000000e+00> : vector<8xf32>
    %76 = vector.multi_reduction <add>, %75, %cst_34 [1] : vector<8x32xf32> to vector<8xf32>
    %77 = vector.shape_cast %76 : vector<8xf32> to vector<8x1xf32>
    %cst_35 = arith.constant 3.200000e+01 : f32
    %78 = vector.broadcast %cst_35 : f32 to vector<8x1xf32>
    %79 = arith.divf %77, %78 : vector<8x1xf32>
    %80 = vector.broadcast %72 : vector<8x1xf32> to vector<8x32xf32>
    %81 = arith.subf %68, %80 : vector<8x32xf32>
    %cst_36 = arith.constant 9.99999974E-6 : f32
    %82 = vector.broadcast %cst_36 : f32 to vector<8x1xf32>
    %83 = arith.addf %79, %82 : vector<8x1xf32>
    %84 = math.rsqrt %83 : vector<8x1xf32>
    %85 = vector.broadcast %84 : vector<8x1xf32> to vector<8x32xf32>
    %86 = arith.mulf %81, %85 : vector<8x32xf32>
    %c0_37 = arith.constant 0 : index
    %c0_38 = arith.constant 0 : index
    %87 = vector.load %arg12[%c0_37, %c0_38] : memref<1x32xf32, #tpu.memory_space<vmem>>, vector<1x32xf32>
    %88 = vector.broadcast %87 : vector<1x32xf32> to vector<8x32xf32>
    %89 = arith.mulf %86, %88 : vector<8x32xf32>
    %c0_39 = arith.constant 0 : index
    %c0_40 = arith.constant 0 : index
    %90 = vector.load %arg13[%c0_39, %c0_40] : memref<1x32xf32, #tpu.memory_space<vmem>>, vector<1x32xf32>
    %91 = vector.broadcast %90 : vector<1x32xf32> to vector<8x32xf32>
    %92 = arith.addf %89, %91 : vector<8x32xf32>
    %c0_41 = arith.constant 0 : index
    %c0_42 = arith.constant 0 : index
    %93 = vector.load %arg14[%c0_41, %c0_42] : memref<8x32xf32, #tpu.memory_space<vmem>>, vector<8x32xf32>
    tpu.vector_store %arg14[%c0_41, %c0_42], %92 {strides = array<i32>} : memref<8x32xf32, #tpu.memory_space<vmem>>, vector<8x32xf32>,
    return
  }
  func.func @transform_0(%arg0: i32) -> (i32, i32) {
    %c0_i32 = arith.constant 0 : i32
    %c0_i32_0 = arith.constant 0 : i32
    return %arg0, %c0_i32 : i32, i32
  }
  func.func @transform_1(%arg0: i32) -> (i32, i32) {
    %c0_i32 = arith.constant 0 : i32
    %c0_i32_0 = arith.constant 0 : i32
    %c0_i32_1 = arith.constant 0 : i32
    return %c0_i32, %c0_i32_0 : i32, i32
  }
  func.func @transform_2(%arg0: i32) -> (i32, i32) {
    %c0_i32 = arith.constant 0 : i32
    %c0_i32_0 = arith.constant 0 : i32
    %c0_i32_1 = arith.constant 0 : i32
    return %c0_i32, %c0_i32_0 : i32, i32
  }
  func.func @transform_3(%arg0: i32) -> (i32, i32) {
    %c0_i32 = arith.constant 0 : i32
    %c0_i32_0 = arith.constant 0 : i32
    %c0_i32_1 = arith.constant 0 : i32
    return %c0_i32, %c0_i32_0 : i32, i32
  }
  func.func @transform_4(%arg0: i32) -> (i32, i32) {
    %c0_i32 = arith.constant 0 : i32
    %c0_i32_0 = arith.constant 0 : i32
    %c0_i32_1 = arith.constant 0 : i32
    return %c0_i32, %c0_i32_0 : i32, i32
  }
  func.func @transform_5(%arg0: i32) -> (i32, i32) {
    %c0_i32 = arith.constant 0 : i32
    %c0_i32_0 = arith.constant 0 : i32
    %c0_i32_1 = arith.constant 0 : i32
    return %c0_i32, %c0_i32_0 : i32, i32
  }
  func.func @transform_6(%arg0: i32) -> (i32, i32) {
    %c0_i32 = arith.constant 0 : i32
    %c0_i32_0 = arith.constant 0 : i32
    %c0_i32_1 = arith.constant 0 : i32
    return %c0_i32, %c0_i32_0 : i32, i32
  }
  func.func @transform_7(%arg0: i32) -> (i32, i32) {
    %c0_i32 = arith.constant 0 : i32
    %c0_i32_0 = arith.constant 0 : i32
    %c0_i32_1 = arith.constant 0 : i32
    return %c0_i32, %c0_i32_0 : i32, i32
  }
  func.func @transform_8(%arg0: i32) -> (i32, i32) {
    %c0_i32 = arith.constant 0 : i32
    %c0_i32_0 = arith.constant 0 : i32
    %c0_i32_1 = arith.constant 0 : i32
    return %c0_i32, %c0_i32_0 : i32, i32
  }
  func.func @transform_9(%arg0: i32) -> (i32, i32) {
    %c0_i32 = arith.constant 0 : i32
    %c0_i32_0 = arith.constant 0 : i32
    %c0_i32_1 = arith.constant 0 : i32
    return %c0_i32, %c0_i32_0 : i32, i32
  }
  func.func @transform_10(%arg0: i32) -> (i32, i32) {
    %c0_i32 = arith.constant 0 : i32
    %c0_i32_0 = arith.constant 0 : i32
    %c0_i32_1 = arith.constant 0 : i32
    return %c0_i32, %c0_i32_0 : i32, i32
  }
  func.func @transform_11(%arg0: i32) -> (i32, i32) {
    %c0_i32 = arith.constant 0 : i32
    %c0_i32_0 = arith.constant 0 : i32
    %c0_i32_1 = arith.constant 0 : i32
    return %c0_i32, %c0_i32_0 : i32, i32
  }
  func.func @transform_12(%arg0: i32) -> (i32, i32) {
    %c0_i32 = arith.constant 0 : i32
    %c0_i32_0 = arith.constant 0 : i32
    %c0_i32_1 = arith.constant 0 : i32
    return %c0_i32, %c0_i32_0 : i32, i32
  }
  func.func @transform_13(%arg0: i32) -> (i32, i32) {
    %c0_i32 = arith.constant 0 : i32
    %c0_i32_0 = arith.constant 0 : i32
    return %arg0, %c0_i32 : i32, i32
  }
}

module attributes {stable_mosaic.version = 11 : i64} {
  func.func @stage1_kernel(%arg0: memref<8x32xbf16, #tpu.memory_space<vmem>>, %arg1: memref<8x8xbf16, #tpu.memory_space<vmem>>, %arg2: memref<32x32xbf16, #tpu.memory_space<vmem>>, %arg3: memref<1x32xf32, #tpu.memory_space<vmem>>, %arg4: memref<32x32xbf16, #tpu.memory_space<vmem>>, %arg5: memref<1x32xf32, #tpu.memory_space<vmem>>, %arg6: memref<8x32xbf16, #tpu.memory_space<vmem>>, %arg7: memref<32x64xbf16, #tpu.memory_space<vmem>>, %arg8: memref<1x64xf32, #tpu.memory_space<vmem>>, %arg9: memref<32x64xbf16, #tpu.memory_space<vmem>>, %arg10: memref<1x64xf32, #tpu.memory_space<vmem>>, %arg11: memref<8x64xbf16, #tpu.memory_space<vmem>>, %arg12: memref<8x64xbf16, #tpu.memory_space<vmem>>) attributes {dimension_semantics = [], scalar_prefetch = 0 : i64, scratch_operands = 0 : i64, tpu.core_type = #tpu.core_type<tc>} {
    %c0 = arith.constant 0 : index
    %c0_0 = arith.constant 0 : index
    %0 = vector.load %arg6[%c0, %c0_0] : memref<8x32xbf16, #tpu.memory_space<vmem>>, vector<8x32xbf16>
    %c0_1 = arith.constant 0 : index
    %c0_2 = arith.constant 0 : index
    %1 = vector.load %arg7[%c0_1, %c0_2] : memref<32x64xbf16, #tpu.memory_space<vmem>>, vector<32x64xbf16>
    %cst = arith.constant dense<0.000000e+00> : vector<8x64xf32>
    %2 = tpu.matmul %0, %1, %cst {dimension_numbers = #tpu.dot_dimension_numbers<[1], [0], [0], [1], [0, 0, 1, 1], [], []>} : vector<8x32xbf16>, vector<32x64xbf16>, vector<8x64xf32> -> vector<8x64xf32>
    %c0_3 = arith.constant 0 : index
    %c0_4 = arith.constant 0 : index
    %3 = vector.load %arg8[%c0_3, %c0_4] : memref<1x64xf32, #tpu.memory_space<vmem>>, vector<1x64xf32>
    %4 = vector.broadcast %3 : vector<1x64xf32> to vector<8x64xf32>
    %5 = arith.addf %2, %4 : vector<8x64xf32>
    %6 = arith.truncf %5 : vector<8x64xf32> to vector<8x64xbf16>
    %c0_5 = arith.constant 0 : index
    %c0_6 = arith.constant 0 : index
    %7 = vector.load %arg11[%c0_5, %c0_6] : memref<8x64xbf16, #tpu.memory_space<vmem>>, vector<8x64xbf16>
    tpu.vector_store %arg11[%c0_5, %c0_6], %6 {strides = array<i32>} : memref<8x64xbf16, #tpu.memory_space<vmem>>, vector<8x64xbf16>,
    %c0_7 = arith.constant 0 : index
    %c0_8 = arith.constant 0 : index
    %8 = vector.load %arg0[%c0_7, %c0_8] : memref<8x32xbf16, #tpu.memory_space<vmem>>, vector<8x32xbf16>
    %c0_9 = arith.constant 0 : index
    %c0_10 = arith.constant 0 : index
    %9 = vector.load %arg1[%c0_9, %c0_10] : memref<8x8xbf16, #tpu.memory_space<vmem>>, vector<8x8xbf16>
    %c0_11 = arith.constant 0 : index
    %c0_12 = arith.constant 0 : index
    %10 = vector.load %arg2[%c0_11, %c0_12] : memref<32x32xbf16, #tpu.memory_space<vmem>>, vector<32x32xbf16>
    %cst_13 = arith.constant dense<0.000000e+00> : vector<8x32xf32>
    %11 = tpu.matmul %8, %10, %cst_13 {dimension_numbers = #tpu.dot_dimension_numbers<[1], [0], [0], [1], [0, 0, 1, 1], [], []>} : vector<8x32xbf16>, vector<32x32xbf16>, vector<8x32xf32> -> vector<8x32xf32>
    %12 = arith.truncf %11 : vector<8x32xf32> to vector<8x32xbf16>
    %cst_14 = arith.constant dense<0.000000e+00> : vector<8x32xf32>
    %13 = tpu.matmul %9, %12, %cst_14 {dimension_numbers = #tpu.dot_dimension_numbers<[1], [0], [0], [1], [0, 0, 1, 1], [], []>} : vector<8x8xbf16>, vector<8x32xbf16>, vector<8x32xf32> -> vector<8x32xf32>
    %c0_15 = arith.constant 0 : index
    %c0_16 = arith.constant 0 : index
    %14 = vector.load %arg3[%c0_15, %c0_16] : memref<1x32xf32, #tpu.memory_space<vmem>>, vector<1x32xf32>
    %15 = vector.broadcast %14 : vector<1x32xf32> to vector<8x32xf32>
    %16 = arith.addf %13, %15 : vector<8x32xf32>
    %cst_17 = arith.constant 0.000000e+00 : f32
    %17 = vector.broadcast %cst_17 : f32 to vector<8x32xf32>
    %18 = arith.maximumf %16, %17 : vector<8x32xf32>
    %19 = arith.truncf %18 : vector<8x32xf32> to vector<8x32xbf16>
    %c0_18 = arith.constant 0 : index
    %c0_19 = arith.constant 0 : index
    %20 = vector.load %arg4[%c0_18, %c0_19] : memref<32x32xbf16, #tpu.memory_space<vmem>>, vector<32x32xbf16>
    %cst_20 = arith.constant dense<0.000000e+00> : vector<8x32xf32>
    %21 = tpu.matmul %19, %20, %cst_20 {dimension_numbers = #tpu.dot_dimension_numbers<[1], [0], [0], [1], [0, 0, 1, 1], [], []>} : vector<8x32xbf16>, vector<32x32xbf16>, vector<8x32xf32> -> vector<8x32xf32>
    %22 = arith.truncf %21 : vector<8x32xf32> to vector<8x32xbf16>
    %cst_21 = arith.constant dense<0.000000e+00> : vector<8x32xf32>
    %23 = tpu.matmul %9, %22, %cst_21 {dimension_numbers = #tpu.dot_dimension_numbers<[1], [0], [0], [1], [0, 0, 1, 1], [], []>} : vector<8x8xbf16>, vector<8x32xbf16>, vector<8x32xf32> -> vector<8x32xf32>
    %c0_22 = arith.constant 0 : index
    %c0_23 = arith.constant 0 : index
    %24 = vector.load %arg5[%c0_22, %c0_23] : memref<1x32xf32, #tpu.memory_space<vmem>>, vector<1x32xf32>
    %25 = vector.broadcast %24 : vector<1x32xf32> to vector<8x32xf32>
    %26 = arith.addf %23, %25 : vector<8x32xf32>
    %cst_24 = arith.constant 0.000000e+00 : f32
    %27 = vector.broadcast %cst_24 : f32 to vector<8x32xf32>
    %28 = arith.maximumf %26, %27 : vector<8x32xf32>
    %29 = arith.truncf %28 : vector<8x32xf32> to vector<8x32xbf16>
    %c0_25 = arith.constant 0 : index
    %c0_26 = arith.constant 0 : index
    %30 = vector.load %arg9[%c0_25, %c0_26] : memref<32x64xbf16, #tpu.memory_space<vmem>>, vector<32x64xbf16>
    %cst_27 = arith.constant dense<0.000000e+00> : vector<8x64xf32>
    %31 = tpu.matmul %29, %30, %cst_27 {dimension_numbers = #tpu.dot_dimension_numbers<[1], [0], [0], [1], [0, 0, 1, 1], [], []>} : vector<8x32xbf16>, vector<32x64xbf16>, vector<8x64xf32> -> vector<8x64xf32>
    %c0_28 = arith.constant 0 : index
    %c0_29 = arith.constant 0 : index
    %32 = vector.load %arg10[%c0_28, %c0_29] : memref<1x64xf32, #tpu.memory_space<vmem>>, vector<1x64xf32>
    %33 = vector.broadcast %32 : vector<1x64xf32> to vector<8x64xf32>
    %34 = arith.addf %31, %33 : vector<8x64xf32>
    %35 = arith.truncf %34 : vector<8x64xf32> to vector<8x64xbf16>
    %c0_30 = arith.constant 0 : index
    %c0_31 = arith.constant 0 : index
    %36 = vector.load %arg12[%c0_30, %c0_31] : memref<8x64xbf16, #tpu.memory_space<vmem>>, vector<8x64xbf16>
    tpu.vector_store %arg12[%c0_30, %c0_31], %35 {strides = array<i32>} : memref<8x64xbf16, #tpu.memory_space<vmem>>, vector<8x64xbf16>,
    return
  }
}

</mosaic_0001>

<bundles_post_ra>
// kernel: s2a_forward.2
= control target key start
LH: loop header
LB: loop body
LE: loop exit
PB: predicated region body
PF: predicated region fallthrough
CT: control target
= control target key end

     0   :  { %v507_v0 = vmov 0.0   ;;  %vm508_vm0 = vmmov 0   ;;  %vm65_vm1 = vcmask 261120   ;;  %vm185_vm2 = vcmask 1043456   ;;  %s657_s2 = inlined_call_operand.vmem [shape: bf16[32,32], index: 2, kind: input, shape index: {}]   ;;  %s658_s7 = inlined_call_operand.vmem [shape: bf16[32,64], index: 7, kind: input, shape index: {}]   ;;  %s659_s0 = inlined_call_operand.vmem [shape: bf16[8,32], index: 0, kind: input, shape index: {}]   ;;  %s660_s6 = inlined_call_operand.vmem [shape: bf16[8,32], index: 6, kind: input, shape index: {}]   ;;  %s661_s8 = inlined_call_operand.vmem [shape: f32[1,64], index: 8, kind: input, shape index: {}]   ;;  %s662_s1 = inlined_call_operand.vmem [shape: bf16[8,8], index: 1, kind: input, shape index: {}]   ;;  %s663_s11 = inlined_call_operand.vmem [shape: bf16[8,64], index: 11, kind: output, shape index: {0}]   ;;  %s664_s4 = inlined_call_operand.vmem [shape: bf16[32,32], index: 4, kind: input, shape index: {}]   ;;  %s665_s3 = inlined_call_operand.vmem [shape: f32[1,32], index: 3, kind: input, shape index: {}]   ;;  %s666_s9 = inlined_call_operand.vmem [shape: bf16[32,64], index: 9, kind: input, shape index: {}]   ;;  %s667_s5 = inlined_call_operand.vmem [shape: f32[1,32], index: 5, kind: input, shape index: {}]   ;;  %s668_s10 = inlined_call_operand.vmem [shape: f32[1,64], index: 10, kind: input, shape index: {}]   ;;  %s669_s12 = inlined_call_operand.vmem [shape: bf16[8,64], index: 12, kind: output, shape index: {1}]  }
   0x1   :  { %461 = vmatprep.subr.bf16.mxu1 %v507_v0  ;;  %v499_v1 = vld [vmem:[%s657_s2 + $0x8] sm:$0xff]   ;;  %465 = vmatprep.mubr.msk.bf16.mxu1 %vm508_vm0, %v507_v0  ;;  %v500_v2 = vld [vmem:[%s657_s2] sm:$0xff]   ;;  %vm181_vm3 = vcmask 64512   ;;  %vm110_vm4 = vcmask 519168  }
   0x2   :  { %453 = vmatprep.subr.bf16.mxu0 %v507_v0  ;;  %457 = vmatprep.mubr.msk.bf16.mxu0 %vm508_vm0, %v507_v0  ;;  %v501_v3 = vld [vmem:[%s658_s7 + $0x8] sm:$0xff]   ;;  %v502_v4 = vld [vmem:[%s658_s7] sm:$0xff]  }
   0x3   :  { %462 = vmatpush3.bf16.msra.mxu1 %v499_v1  ;;  %454 = vmatpush3.bf16.msra.mxu0 %v501_v3  ;;  %v112_v5 = vld [vmem:[%s659_s0] sm:$0xf]  ;;  %v503_v21 = vld [vmem:[%s664_s4 + $0x8] sm:$0xff]  }
   0x4   :  { %463 = vmatprep.subr.bf16.mxu1 %v507_v0  ;;  %455 = vmatprep.subr.bf16.mxu0 %v507_v0  ;;  %v41_v6 = vld [vmem:[%s660_s6] sm:$0xf]  ;;  %v505_v37 = vld [vmem:[%s666_s9 + $0x8] sm:$0xff]  }
   0x5   :  { %v419_v9 = vld [vmem:[%s661_s8] ss:$0 sm:$0xff] }
   0x6   :  { %v113_v14 = vld [vmem:[%s662_s1] sm:$0xf] }
   0x7   :  { %464 = vmatpush3.bf16.msra.mxu1 %v500_v2  ;;  %456 = vmatpush3.bf16.msra.mxu0 %v502_v4  ;;  %v504_v22 = vld [vmem:[%s664_s4] sm:$0xff]  }
   0x8   :  { %475 = vmatprep.subr.bf16.mxu1 %v507_v0  ;;  %469 = vmatprep.subr.bf16.mxu0 %v507_v0  ;;  %v426_v23 = vld [vmem:[%s665_s3] ss:$0 sm:$0xff] }
   0x9   :  { %v506_v38 = vld [vmem:[%s666_s9] sm:$0xff]  }
   0xa   :  { %466 = vmatmul.mubr.msk.bf16.vlgmr.msra.gmra.mxu1 %vm65_vm1, %v112_v5  ;;  %458 = vmatmul.mubr.msk.bf16.vlgmr.msra.gmra.mxu0 %vm65_vm1, %v41_v6  ;;  %v431_v39 = vld [vmem:[%s667_s5] ss:$0 sm:$0xff] }
   0xb   :  { %479 = vmatprep.mubr.msk.bf16.mxu1 %vm508_vm0, %v507_v0  ;;  %471 = vmatprep.mubr.msk.bf16.mxu0 %vm508_vm0, %v507_v0  ;;  %v433_v47 = vld [vmem:[%s668_s10] ss:$0 sm:$0xff] }
   0xc   :  { %476 = vmatpush3.bf16.msra.mxu1 %v503_v21 }
   0xd   :  { %477 = vmatprep.subr.bf16.mxu1 %v507_v0 }
  0x10   :  { %478 = vmatpush3.bf16.msra.mxu1 %v504_v22 }
  0x11   :  { %489 = vmatprep.subr.bf16.mxu1 %v507_v0 }
  0xca   :  { %v167_v7 = vpop.f32.mrf.mxu1  ;;  %v103_v12 = vpop.f32.mrf.mxu0 }
  0xcb   :  { %v173_v8 = vpack.c.bf16 %v167_v7, %v167_v7  ;;  %v104_v15 = vadd.f32 %v419_v9, %v103_v12 }
  0xcc   :  { %v467_v10 = vpop.f32.mrf.mxu1  ;;  %v459_v16 = vpop.f32.mrf.mxu0 }
  0xcd   :  { %v187_v11 = vsel %vm185_vm2, %v173_v8, 0  ;;  %v109_v18 = vpack.c.bf16 %v104_v15, %v104_v15 }
  0xce   :  { %v170_v13 = vpop.f32.mrf.mxu1  ;;  %470 = vmatpush3.bf16.msra.mxu0 %v187_v11  ;;  %v106_v19 = vpop.f32.mrf.mxu0 }
  0xcf   :  { %483 = vmatprep.subr.bf16.mxu0 %v507_v0  ;;  %111 = vst.msk [vmem:[%s663_s11] sm:$0xf] %vm110_vm4, %v109_v18 }
  0xd0   :  { %v468_v17 = vpop.f32.mrf.mxu1  ;;  %v460_v20 = vpop.f32.mrf.mxu0 }
  0xd1   :  { %472 = vmatmul.mubr.msk.bf16.vlgmr.msra.gmra.mxu0 %vm181_vm3, %v113_v14 }
  0xd2   :  { %485 = vmatprep.mubr.msk.bf16.mxu0 %vm508_vm0, %v507_v0 }
 0x191   :  { %v223_v24 = vpop.f32.mrf.mxu0 }
 0x192   :  { %v224_v25 = vadd.f32 %v426_v23, %v223_v24 }
 0x193   :  { %v473_v26 = vpop.f32.mrf.mxu0 }
 0x194   :  { %v229_v27 = vmax.f32 %v224_v25, 0.0 }
 0x195   :  { %v226_v28 = vpop.f32.mrf.mxu0 }
 0x196   :  { %v230_v29 = vpack.c.bf16 %v229_v27, %v229_v27 }
 0x197   :  { %v474_v30 = vpop.f32.mrf.mxu0 }
 0x198   :  { %480 = vmatmul.mubr.msk.bf16.vlgmr.msra.gmra.mxu1 %vm65_vm1, %v230_v29 }
 0x199   :  { %493 = vmatprep.mubr.msk.bf16.mxu1 %vm508_vm0, %v507_v0  ;;  %490 = vmatpush3.bf16.msra.mxu1 %v505_v37 }
 0x19a   :  { %491 = vmatprep.subr.bf16.mxu1 %v507_v0 }
 0x19d   :  { %492 = vmatpush3.bf16.msra.mxu1 %v506_v38 }
 0x258   :  { %v284_v31 = vpop.f32.mrf.mxu1 }
 0x259   :  { %v290_v32 = vpack.c.bf16 %v284_v31, %v284_v31 }
 0x25a   :  { %v481_v33 = vpop.f32.mrf.mxu1 }
 0x25b   :  { %v299_v34 = vsel %vm185_vm2, %v290_v32, 0 }
 0x25c   :  { %v287_v35 = vpop.f32.mrf.mxu1  ;;  %484 = vmatpush3.bf16.msra.mxu0 %v299_v34 }
 0x25e   :  { %v482_v36 = vpop.f32.mrf.mxu1 }
 0x25f   :  { %486 = vmatmul.mubr.msk.bf16.vlgmr.msra.gmra.mxu0 %vm181_vm3, %v113_v14 }
 0x31f   :  { %v335_v40 = vpop.f32.mrf.mxu0 }
 0x320   :  { %v336_v41 = vadd.f32 %v431_v39, %v335_v40 }
 0x321   :  { %v487_v42 = vpop.f32.mrf.mxu0 }
 0x322   :  { %v341_v43 = vmax.f32 %v336_v41, 0.0 }
 0x323   :  { %v338_v44 = vpop.f32.mrf.mxu0 }
 0x324   :  { %v342_v45 = vpack.c.bf16 %v341_v43, %v341_v43 }
 0x325   :  { %v488_v46 = vpop.f32.mrf.mxu0 }
 0x326   :  { %494 = vmatmul.mubr.msk.bf16.vlgmr.msra.gmra.mxu1 %vm65_vm1, %v342_v45 }
 0x3e6   :  { %v403_v48 = vpop.f32.mrf.mxu1 }
 0x3e7   :  { %v404_v49 = vadd.f32 %v433_v47, %v403_v48 }
 0x3e8   :  { %v495_v50 = vpop.f32.mrf.mxu1 }
 0x3e9   :  { %v409_v51 = vpack.c.bf16 %v404_v49, %v404_v49 }
 0x3ea   :  { %v406_v52 = vpop.f32.mrf.mxu1 }
 0x3eb   :  { %410 = vst.msk [vmem:[%s669_s12] sm:$0xf] %vm110_vm4, %v409_v51 }
 0x3ec   :  { %v496_v53 = vpop.f32.mrf.mxu1 }

// kernel: s2a_forward.3
= control target key start
LH: loop header
LB: loop body
LE: loop exit
PB: predicated region body
PF: predicated region fallthrough
CT: control target
= control target key end

     0   :  { %v2386_v1 = vmov 0.0   ;;  %vm2387_vm0 = vmmov 0   ;;  %vm76_vm1 = vcmask 261120   ;;  %s2388_s14 = smov 120   ;;  %s2760_s0 = inlined_call_operand.vmem [shape: bf16[8,32], index: 0, kind: input, shape index: {}]   ;;  %s2761_s1 = inlined_call_operand.vmem [shape: bf16[8,64], index: 1, kind: input, shape index: {}]   ;;  %s2762_s2 = inlined_call_operand.vmem [shape: bf16[8,64], index: 2, kind: input, shape index: {}]   ;;  %s2763_s3 = inlined_call_operand.vmem [shape: bf16[32,32], index: 3, kind: input, shape index: {}]   ;;  %s2764_s4 = inlined_call_operand.vmem [shape: f32[1,32], index: 4, kind: input, shape index: {}]   ;;  %s2765_s5 = inlined_call_operand.vmem [shape: bf16[32,32], index: 5, kind: input, shape index: {}]   ;;  %s2766_s6 = inlined_call_operand.vmem [shape: f32[1,32], index: 6, kind: input, shape index: {}]   ;;  %s2767_s7 = inlined_call_operand.vmem [shape: bf16[32,32], index: 7, kind: input, shape index: {}]   ;;  %s2768_s8 = inlined_call_operand.vmem [shape: f32[1,32], index: 8, kind: input, shape index: {}]   ;;  %s2769_s9 = inlined_call_operand.vmem [shape: bf16[32,32], index: 9, kind: input, shape index: {}]   ;;  %s2770_s10 = inlined_call_operand.vmem [shape: f32[1,32], index: 10, kind: input, shape index: {}]   ;;  %s2771_s11 = inlined_call_operand.vmem [shape: f32[1,32], index: 11, kind: input, shape index: {}]   ;;  %s2772_s12 = inlined_call_operand.vmem [shape: f32[1,32], index: 12, kind: input, shape index: {}]   ;;  %s2773_s13 = inlined_call_operand.hbm [shape: f32[8,32], index: 13, kind: output, shape index: {}]  }
   0x1   :  { %v2320_v0 = vld [vmem:[%s2763_s3 + $0x8] sm:$0xff]   ;;  %2179 = vmatprep.subr.bf16.mxu0 %v2386_v1  ;;  %2187 = vmatprep.subr.bf16.mxu1 %v2386_v1  ;;  %v2321_v2 = vld [vmem:[%s2763_s3] sm:$0xff]   ;;  %s2389_s3 = smov 104  }
   0x2   :  { %2180 = vmatpush3.bf16.msra.mxu0 %v2320_v0  ;;  %2183 = vmatprep.mubr.msk.bf16.mxu0 %vm2387_vm0, %v2386_v1  ;;  %v2481_v3 = vld [vmem:[%s2761_s1] sm:$0xf]  ;;  %s2390_s1 = smov 112  }
   0x3   :  { %2181 = vmatprep.subr.bf16.mxu0 %v2386_v1  ;;  %129 = vrot.lane.b32.xlu0 %v2481_v3, %s2388_s14  ;;  %v46_v4 = vld [vmem:[%s2760_s0] sm:$0xf] }
   0x4   :  { %135 = vrot.lane.b32.xlu1 %v2481_v3, %s2389_s3  ;;  %2189 = vmatprep.mubr.msk.bf16.mxu1 %vm2387_vm0, %v2386_v1 }
   0x6   :  { %2182 = vmatpush3.bf16.msra.mxu0 %v2321_v2 }
   0x7   :  { %132 = vrot.lane.b32.xlu0 %v2481_v3, %s2390_s1  ;;  %2199 = vmatprep.subr.bf16.mxu0 %v2386_v1 }
   0x8   :  { %18 = vsyncpa [#allocation3], 0  ;;  %vm206_vm2 = vcmask 1043456   ;;  %v2089_v9 = vld [vmem:[%s2764_s4] ss:$0 sm:$0xff]  ;;  %vm202_vm3 = vcmask 64512   ;;  %v2097_v41 = vcombine.low %v2481_v3, %v2481_v3 }
   0x9   :  { %2184 = vmatmul.mubr.msk.bf16.vlgmr.msra.gmra.mxu0 %vm76_vm1, %v46_v4  ;;  %s2391_s4 = smov 96   ;;  %s2395_s24 = smov 8   ;;  %vm981_vm4 = vcmask 130048   ;;  %vm983_vm5 = vcmask 195584  }
   0xa   :  { %2201 = vmatprep.mubr.msk.bf16.mxu0 %vm2387_vm0, %v2386_v1  ;;  %s2396_s25 = smov 24  }
  0x25   :  { %138 = vxpose.xlu0.c.b16.start.end [1/1] (short) (narrow) %v2481_v3, 16 }
  0x75   :  { %v2500_v5 = vpop.permute.xlu0 %129 }
  0x76   :  { %v2516_v16 = vpop.permute.xlu1 %135  ;;  %v2098_v50 = vcombine.low %v2500_v5, %v2500_v5 }
  0x79   :  { %v2502_v6 = vpop.permute.xlu0 %132 }
  0x7a   :  { %v2099_v4 = vcombine.low %v2502_v6, %v2502_v6 }
  0x87   :  { %v146_v7 = vpop.trf.xlu0 }
  0x88   :  { %v208_v8 = vsel %vm206_vm2, %v146_v7, 0 }
  0x89   :  { %2188 = vmatpush3.bf16.msra.mxu1 %v208_v8 }
  0x8a   :  { %2193 = vmatprep.subr.bf16.mxu1 %v2386_v1 }
  0xc9   :  { %v114_v10 = vpop.f32.mrf.mxu0 }
  0xca   :  { %v115_v11 = vadd.f32 %v2089_v9, %v114_v10  ;;  %v2100_v9 = vcombine.low %v2516_v16, %v2516_v16 }
  0xcb   :  { %v2185_v12 = vpop.f32.mrf.mxu0 }
  0xcc   :  { %v120_v13 = vpack.c.bf16 %v115_v11, %v115_v11 }
  0xcd   :  { %v117_v14 = vpop.f32.mrf.mxu0 }
  0xce   :  { %124 = vrot.lane.b32.xlu0 %v120_v13, %s2390_s1  ;;  %122 = vrot.lane.b32.xlu1 %v120_v13, %s2388_s14 }
  0xcf   :  { %2190 = vmatmul.mubr.msk.bf16.vlgmr.msra.gmra.mxu1 %vm202_vm3, %v120_v13  ;;  %v2186_v15 = vpop.f32.mrf.mxu0 }
  0xd0   :  { %2195 = vmatprep.mubr.msk.bf16.mxu1 %vm2387_vm0, %v2386_v1 }
  0xd2   :  { %126 = vrot.lane.b32.xlu1 %v120_v13, %s2389_s3 }
  0xec   :  { %170 = vxpose.xlu0.c.b16.start.end [1/1] (short) (narrow) %v2502_v6, 16 }
  0xf0   :  { %186 = vxpose.xlu0.c.b16.start.end [1/1] (short) (narrow) %v2516_v16, 16 }
  0xf5   :  { %154 = vxpose.xlu1.c.b16.start.end [1/1] (short) (narrow) %v2500_v5, 16 }
 0x140   :  { %v125_v17 = vpop.permute.xlu0 %124  ;;  %v123_v18 = vpop.permute.xlu1 %122 }
 0x144   :  { %v127_v21 = vpop.permute.xlu1 %126 }
 0x14e   :  { %v178_v19 = vpop.trf.xlu0 }
 0x14f   :  { %v300_v20 = vsel %vm206_vm2, %v178_v19, 0 }
 0x150   :  { %2200 = vmatpush3.bf16.msra.mxu0 %v300_v20 }
 0x151   :  { %2211 = vmatprep.subr.bf16.mxu0 %v2386_v1 }
 0x152   :  { %v194_v23 = vpop.trf.xlu0 }
 0x153   :  { %2202 = vmatmul.mubr.msk.bf16.vlgmr.msra.gmra.mxu0 %vm202_vm3, %v125_v17  ;;  %v346_v25 = vsel %vm206_vm2, %v194_v23, 0 }
 0x154   :  { %2213 = vmatprep.mubr.msk.bf16.mxu0 %vm2387_vm0, %v2386_v1 }
 0x157   :  { %v162_v22 = vpop.trf.xlu1 }
 0x158   :  { %v254_v24 = vsel %vm206_vm2, %v162_v22, 0 }
 0x159   :  { %2194 = vmatpush3.bf16.msra.mxu1 %v254_v24 }
 0x15a   :  { %2205 = vmatprep.subr.bf16.mxu1 %v2386_v1 }
 0x15c   :  { %2196 = vmatmul.mubr.msk.bf16.vlgmr.msra.gmra.mxu1 %vm202_vm3, %v123_v18 }
 0x15d   :  { %2206 = vmatpush3.bf16.msra.mxu1 %v346_v25  ;;  %2207 = vmatprep.mubr.msk.bf16.mxu1 %vm2387_vm0, %v2386_v1 }
 0x15e   :  { %2217 = vmatprep.subr.bf16.mxu1 %v2386_v1 }
 0x164   :  { %2208 = vmatmul.mubr.msk.bf16.vlgmr.msra.gmra.mxu1 %vm202_vm3, %v127_v21 }
 0x165   :  { %2219 = vmatprep.mubr.msk.bf16.mxu1 %vm2387_vm0, %v2386_v1 }
 0x18f   :  { %v244_v26 = vpop.f32.mrf.mxu1 }
 0x190   :  { %v388_v27 = vsel %vm202_vm3, %v244_v26, -inf }
 0x191   :  { %389 = vmax.xlane.f32.xlu1 %v388_v27  ;;  %v2191_v28 = vpop.f32.mrf.mxu1 }
 0x193   :  { %v247_v29 = vpop.f32.mrf.mxu1 }
 0x195   :  { %v2192_v30 = vpop.f32.mrf.mxu1 }
 0x213   :  { %v336_v31 = vpop.f32.mrf.mxu0 }
 0x214   :  { %v394_v32 = vsel %vm202_vm3, %v336_v31, -inf }
 0x215   :  { %395 = vmax.xlane.f32.xlu1 %v394_v32  ;;  %v2203_v33 = vpop.f32.mrf.mxu0 }
 0x217   :  { %v339_v34 = vpop.f32.mrf.mxu0 }
 0x219   :  { %v2204_v35 = vpop.f32.mrf.mxu0 }
 0x21a   :  { %v390_v47 = vpop.xlane.xlu1 %389 }
 0x21b   :  { %v400_v48 = vsub.f32 %v244_v26, %v390_v47 }
 0x21c   :  { %v290_v36 = vpop.f32.mrf.mxu1 }
 0x21d   :  { %v391_v37 = vsel %vm202_vm3, %v290_v36, -inf  ;;  %v404_v49 = vmul.f32 1.442695, %v400_v48 }
 0x21e   :  { %392 = vmax.xlane.f32.xlu0 %v391_v37  ;;  %v2197_v38 = vpop.f32.mrf.mxu1 }
 0x21f   :  { %2330 = vpow2.f32 %v404_v49 }
 0x220   :  { %v293_v39 = vpop.f32.mrf.mxu1 }
 0x222   :  { %v2198_v40 = vpop.f32.mrf.mxu1 }
 0x224   :  { %v382_v42 = vpop.f32.mrf.mxu1 }
 0x225   :  { %v397_v43 = vsel %vm202_vm3, %v382_v42, -inf }
 0x226   :  { %398 = vmax.xlane.f32.xlu0 %v397_v43  ;;  %v2209_v44 = vpop.f32.mrf.mxu1  ;;  %444 = vrot.lane.b32.xlu1 %v2097_v41, %s2391_s4 }
 0x228   :  { %v385_v45 = vpop.f32.mrf.mxu1 }
 0x22a   :  { %v2210_v46 = vpop.f32.mrf.mxu1 }
 0x22c   :  { %v2331_v51 = vpop.eup %2330 }
 0x22d   :  { %v412_v52 = vsel %vm202_vm3, %v2331_v51, 0.0 }
 0x23c   :  { %446 = vrot.lane.b32.xlu0 %v2098_v50, %s2391_s4 }
 0x24a   :  { %413 = vadd.xlane.f32.xlu1 %v412_v52  ;;  %v2392_v52 = vmov 1983009808  }
 0x29e   :  { %v396_v53 = vpop.xlane.xlu1 %395 }
 0x29f   :  { %v402_v54 = vsub.f32 %v336_v31, %v396_v53  ;;  %v835_v53 = vunpack.c.l.s4 %v2392_v52 }
 0x2a1   :  { %v408_v55 = vmul.f32 1.442695, %v402_v54  ;;  %v837_v54 = vlaneseq }
 0x2a2   :  { %v445_v7 = vpop.permute.xlu1 %444 }
 0x2a3   :  { %2332 = vpow2.f32 %v408_v55 }
 0x2a7   :  { %v393_v56 = vpop.xlane.xlu0 %392 }
 0x2a8   :  { %v401_v57 = vsub.f32 %v290_v36, %v393_v56  ;;  %v2393_v56 = vmov 1934713408  }
 0x2aa   :  { %v406_v58 = vmul.f32 1.442695, %v401_v57  ;;  %v867_v57 = vunpack.c.l.s4 %v2393_v56 }
 0x2ac   :  { %2334 = vpow2.f32 %v406_v58  ;;  %v836_v58 = vunpack.c.0.s8 %v835_v53 }
 0x2af   :  { %v399_v59 = vpop.xlane.xlu0 %398 }
 0x2b0   :  { %v2333_v60 = vpop.eup %2332  ;;  %v403_v61 = vsub.f32 %v382_v42, %v399_v59  ;;  %v838_v59 = vshrl.u32 %v837_v54, 7 }
 0x2b1   :  { %v418_v62 = vsel %vm202_vm3, %v2333_v60, 0.0 }
 0x2b2   :  { %v410_v63 = vmul.f32 1.442695, %v403_v61  ;;  %419 = vadd.xlane.f32.xlu1 %v418_v62  ;;  %v868_v61 = vunpack.c.0.s8 %v867_v57  ;;  %v2575_v62 = vsub.s32 %v836_v58, %v838_v59 }
 0x2b3   :  { %v447_v6 = vpop.permute.xlu0 %446 }
 0x2b4   :  { %2336 = vpow2.f32 %v410_v63 }
 0x2b9   :  { %v2335_v0 = vpop.eup %2334 }
 0x2ba   :  { %v415_v2 = vsel %vm202_vm3, %v2335_v0, 0.0 }
 0x2bb   :  { %416 = vadd.xlane.f32.xlu0 %v415_v2 }
 0x2c1   :  { %v2337_v3 = vpop.eup %2336 }
 0x2c2   :  { %v421_v5 = vsel %vm202_vm3, %v2337_v3, 0.0 }
 0x2c3   :  { %422 = vadd.xlane.f32.xlu0 %v421_v5  ;;  %448 = vrot.lane.b32.xlu1 %v2099_v4, %s2391_s4  ;;  %v2577_v5 = vsub.s32 %v868_v61, %v838_v59 }
 0x2d3   :  { %v414_v8 = vpop.xlane.xlu1 %413 }
 0x2d4   :  { %2338 = vrcp.f32 %v414_v8 }
 0x2d9   :  { %450 = vrot.lane.b32.xlu0 %v2100_v9, %s2391_s4 }
 0x2e1   :  { %v2339_v10 = vpop.eup %2338 }
 0x2e2   :  { %v428_v11 = vmul.f32 %v2339_v10, %v2331_v51 }
 0x2e4   :  { %v432_v12 = vpack.c.bf16 %v428_v11, %v428_v11 }
 0x2e6   :  { %v524_v13 = vsel %vm202_vm3, %v432_v12, 0  ;;  %456 = vxpose.xlu1.c.b16.start.end [1/1] (short) (narrow) %v445_v7, 16 }
 0x2e7   :  { %2212 = vmatpush3.bf16.xpose.msra.mxu0 %v524_v13 }
 0x2e8   :  { %2223 = vmatprep.subr.bf16.mxu0 %v2386_v1 }
 0x2f7   :  { %472 = vxpose.xlu0.c.b16.start.end [1/1] (short) (narrow) %v447_v6, 16 }
 0x33b   :  { %v420_v14 = vpop.xlane.xlu1 %419 }
 0x33c   :  { %2340 = vrcp.f32 %v420_v14  ;;  %v2323_v14 = vld [vmem:[%s2765_s5 + $0x8] sm:$0xff]  }
 0x33f   :  { %v449_v15 = vpop.permute.xlu1 %448 }
 0x340   :  { %488 = vxpose.xlu1.c.b16.start.end [1/1] (short) (narrow) %v449_v15, 16 }
 0x344   :  { %v417_v17 = vpop.xlane.xlu0 %416 }
 0x345   :  { %2342 = vrcp.f32 %v417_v17 }
 0x348   :  { %v464_v16 = vpop.trf.xlu1 }
 0x349   :  { %v2341_v18 = vpop.eup %2340  ;;  %2214 = vmatmul.mubr.msk.bf16.vlgmr.msra.gmra.mxu0 %vm202_vm3, %v464_v16 }
 0x34a   :  { %v430_v19 = vmul.f32 %v2341_v18, %v2333_v60  ;;  %2225 = vmatprep.mubr.msk.bf16.mxu0 %vm2387_vm0, %v2386_v1 }
 0x34c   :  { %v423_v20 = vpop.xlane.xlu0 %422  ;;  %v434_v21 = vpack.c.bf16 %v430_v19, %v430_v19 }
 0x34d   :  { %2344 = vrcp.f32 %v423_v20 }
 0x34e   :  { %v616_v22 = vsel %vm202_vm3, %v434_v21, 0 }
 0x34f   :  { %2224 = vmatpush3.bf16.xpose.msra.mxu0 %v616_v22 }
 0x350   :  { %v451_v23 = vpop.permute.xlu0 %450  ;;  %2235 = vmatprep.subr.bf16.mxu0 %v2386_v1 }
 0x351   :  { %504 = vxpose.xlu0.c.b16.start.end [1/1] (short) (narrow) %v451_v23, 16  ;;  %v2324_v23 = vld [vmem:[%s2765_s5] sm:$0xff]   ;;  %s2394_s5 = smov 16  }
 0x352   :  { %v2343_v24 = vpop.eup %2342 }
 0x353   :  { %v429_v25 = vmul.f32 %v2343_v24, %v2335_v0 }
 0x355   :  { %v433_v26 = vpack.c.bf16 %v429_v25, %v429_v25 }
 0x357   :  { %v570_v27 = vsel %vm202_vm3, %v433_v26, 0 }
 0x358   :  { %2218 = vmatpush3.bf16.xpose.msra.mxu1 %v570_v27 }
 0x359   :  { %2229 = vmatprep.subr.bf16.mxu1 %v2386_v1  ;;  %v480_v30 = vpop.trf.xlu0 }
 0x35a   :  { %v2345_v28 = vpop.eup %2344 }
 0x35b   :  { %v431_v29 = vmul.f32 %v2345_v28, %v2337_v3 }
 0x35d   :  { %v435_v31 = vpack.c.bf16 %v431_v29, %v431_v29 }
 0x35f   :  { %2220 = vmatmul.mubr.msk.bf16.vlgmr.msra.gmra.mxu1 %vm202_vm3, %v480_v30  ;;  %v662_v32 = vsel %vm202_vm3, %v435_v31, 0 }
 0x360   :  { %2230 = vmatpush3.bf16.xpose.msra.mxu1 %v662_v32  ;;  %2231 = vmatprep.mubr.msk.bf16.mxu1 %vm2387_vm0, %v2386_v1  ;;  %v2325_v32 = vld [vmem:[%s2767_s7 + $0x8] sm:$0xff]  }
 0x361   :  { %2243 = vmatprep.subr.bf16.mxu1 %v2386_v1 }
 0x3a2   :  { %v496_v33 = vpop.trf.xlu1 }
 0x3a3   :  { %2226 = vmatmul.mubr.msk.bf16.vlgmr.msra.gmra.mxu0 %vm202_vm3, %v496_v33 }
 0x3a4   :  { %2239 = vmatprep.mubr.msk.bf16.mxu0 %vm2387_vm0, %v2386_v1  ;;  %2236 = vmatpush3.bf16.msra.mxu0 %v2323_v14 }
 0x3a5   :  { %2237 = vmatprep.subr.bf16.mxu0 %v2386_v1 }
 0x3a8   :  { %2238 = vmatpush3.bf16.msra.mxu0 %v2324_v23 }
 0x3a9   :  { %2251 = vmatprep.subr.bf16.mxu0 %v2386_v1 }
 0x3b3   :  { %v512_v34 = vpop.trf.xlu0 }
 0x3b4   :  { %2232 = vmatmul.mubr.msk.bf16.vlgmr.msra.gmra.mxu1 %vm202_vm3, %v512_v34 }
 0x3b5   :  { %2247 = vmatprep.mubr.msk.bf16.mxu1 %vm2387_vm0, %v2386_v1  ;;  %2244 = vmatpush3.bf16.msra.mxu1 %v2325_v32 }
 0x3b6   :  { %2245 = vmatprep.subr.bf16.mxu1 %v2386_v1 }
 0x409   :  { %v560_v35 = vpop.f32.mrf.mxu0 }
 0x40a   :  { %704 = vxpose.xlu1.b32.start.end [1/1] (short) (narrow) %v560_v35, 8 }
 0x40b   :  { %v2215_v36 = vpop.f32.mrf.mxu0 }
 0x40d   :  { %v563_v37 = vpop.f32.mrf.mxu0 }
 0x40f   :  { %v2216_v38 = vpop.f32.mrf.mxu0 }
 0x41f   :  { %v606_v39 = vpop.f32.mrf.mxu1 }
 0x420   :  { %736 = vxpose.xlu0.b32.start.end [1/1] (short) (narrow) %v606_v39, 8 }
 0x421   :  { %v2221_v40 = vpop.f32.mrf.mxu1 }
 0x423   :  { %v609_v41 = vpop.f32.mrf.mxu1 }
 0x425   :  { %v2222_v42 = vpop.f32.mrf.mxu1 }
 0x463   :  { %v652_v43 = vpop.f32.mrf.mxu0 }
 0x464   :  { %768 = vxpose.xlu0.b32.start.end [1/1] (short) (narrow) %v652_v43, 8 }
 0x465   :  { %v2227_v44 = vpop.f32.mrf.mxu0 }
 0x467   :  { %v655_v45 = vpop.f32.mrf.mxu0 }
 0x469   :  { %v2228_v46 = vpop.f32.mrf.mxu0 }
 0x474   :  { %v698_v47 = vpop.f32.mrf.mxu1 }
 0x475   :  { %800 = vxpose.xlu1.b32.start.end [1/1] (short) (narrow) %v698_v47, 8 }
 0x476   :  { %v2233_v48 = vpop.f32.mrf.mxu1 }
 0x477   :  { %v2326_v48 = vld [vmem:[%s2767_s7] sm:$0xff]  }
 0x478   :  { %v701_v49 = vpop.f32.mrf.mxu1  ;;  %2246 = vmatpush3.bf16.msra.mxu1 %v2326_v48 }
 0x479   :  { %2257 = vmatprep.subr.bf16.mxu1 %v2386_v1  ;;  %v2623_v49 = vld [vmem:[%s2762_s2] sm:$0xf] }
 0x47a   :  { %v2234_v50 = vpop.f32.mrf.mxu1 }
 0x486   :  { %v720_v55 = vpop.trf.xlu1 }
 0x49c   :  { %v752_v51 = vpop.trf.xlu0 }
 0x4e0   :  { %v784_v60 = vpop.trf.xlu0 }
 0x4e1   :  { %v832_v63 = vcombine.low %v720_v55, %v784_v60  ;;  %v833_v0 = vcombine.high %v720_v55, %v784_v60 }
 0x4e3   :  { %v840_v7 = vrot.slane %v832_v63, %v2575_v62  ;;  %v847_v8 = vrot.slane %v833_v0, %v2575_v62 }
 0x4f1   :  { %v816_v2 = vpop.trf.xlu1 }
 0x4f2   :  { %v848_v3 = vcombine.low %v752_v51, %v816_v2  ;;  %v849_v4 = vcombine.high %v752_v51, %v816_v2  ;;  %v2107_v51 = vld [vmem:[%s2766_s6] ss:$0 sm:$0xff] }
 0x4f3   :  { %v2111_v2 = vld [vmem:[%s2768_s8] ss:$0 sm:$0xff] }
 0x4f4   :  { %v856_v9 = vrot.slane %v848_v3, %v2575_v62  ;;  %v863_v10 = vrot.slane %v849_v4, %v2575_v62 }
 0x4f6   :  { %v864_v11 = vcombine.low %v840_v7, %v856_v9  ;;  %v865_v12 = vcombine.high %v840_v7, %v856_v9  ;;  %v880_v13 = vcombine.low %v847_v8, %v863_v10  ;;  %v881_v6 = vcombine.high %v847_v8, %v863_v10 }
 0x4f8   :  { %v872_v15 = vrot.slane %v864_v11, %v2577_v5  ;;  %v879_v17 = vrot.slane %v865_v12, %v2577_v5  ;;  %v888_v16 = vrot.slane %v880_v13, %v2577_v5  ;;  %v895_v18 = vrot.slane %v881_v6, %v2577_v5 }
 0x4fa   :  { %v900_v19 = vcombine.low %v872_v15, %v879_v17  ;;  %v2105_v20 = vcombine.high %v872_v15, %v879_v17  ;;  %v916_v21 = vcombine.low %v888_v16, %v895_v18  ;;  %v2106_v22 = vcombine.high %v888_v16, %v895_v18 }
 0x4fc   :  { %v907_v24 = vrot.slane %v900_v19, %v2575_v62  ;;  %v915_v25 = vrot.slane %v2105_v20, %v2575_v62  ;;  %v923_v26 = vrot.slane %v916_v21, %v2575_v62  ;;  %v931_v27 = vrot.slane %v2106_v22, %v2575_v62 }
 0x4fe   :  { %v933_v28 = vcombine.high %v907_v24, %v915_v25  ;;  %v949_v29 = vcombine.high %v923_v26, %v931_v27  ;;  %v932_v30 = vcombine.low %v907_v24, %v915_v25  ;;  %v948_v31 = vcombine.low %v923_v26, %v931_v27 }
 0x500   :  { %v947_v33 = vrot.slane %v933_v28, %v2577_v5  ;;  %v963_v34 = vrot.slane %v949_v29, %v2577_v5  ;;  %v940_v35 = vrot.slane %v932_v30, %v2577_v5  ;;  %v956_v36 = vrot.slane %v948_v31, %v2577_v5 }
 0x502   :  { %v966_v37 = vcombine.low %v947_v33, %v963_v34  ;;  %v965_v38 = vcombine.high %v940_v35, %v956_v36  ;;  %v964_v39 = vcombine.low %v940_v35, %v956_v36  ;;  %v967_v40 = vcombine.high %v947_v33, %v963_v34 }
 0x504   :  { %973 = vrot.lane.b32.xlu1 %v966_v37, %s2394_s5  ;;  %969 = vrot.lane.b32.xlu0 %v965_v38, %s2395_s24  ;;  %v2119_v38 = vcombine.low %v2623_v49, %v2623_v49 }
 0x508   :  { %977 = vrot.lane.b32.xlu1 %v967_v40, %s2396_s25  ;;  %1132 = vrot.lane.b32.xlu0 %v2623_v49, %s2390_s1 }
 0x50c   :  { %1129 = vrot.lane.b32.xlu1 %v2623_v49, %s2388_s14 }
 0x510   :  { %1135 = vrot.lane.b32.xlu1 %v2623_v49, %s2389_s3 }
 0x533   :  { %1138 = vxpose.xlu1.c.b16.start.end [1/1] (short) (narrow) %v2623_v49, 16 }
 0x576   :  { %v974_v41 = vpop.permute.xlu1 %973  ;;  %v970_v42 = vpop.permute.xlu0 %969 }
 0x577   :  { %v980_v43 = vsel %vm202_vm3, %v964_v39, %v970_v42 }
 0x578   :  { %v982_v45 = vsel %vm981_vm4, %v980_v43, %v974_v41 }
 0x57a   :  { %v978_v44 = vpop.permute.xlu1 %977  ;;  %v2649_v61 = vpop.permute.xlu0 %1132 }
 0x57b   :  { %v984_v46 = vsel %vm983_vm5, %v982_v45, %v978_v44 }
 0x57c   :  { %v985_v47 = vpack.c.bf16 %v984_v46, %v984_v46 }
 0x57e   :  { %2240 = vmatmul.mubr.msk.bf16.vlgmr.msra.gmra.mxu0 %vm76_vm1, %v985_v47  ;;  %v2632_v50 = vpop.permute.xlu1 %1129 }
 0x57f   :  { %2253 = vmatprep.mubr.msk.bf16.mxu0 %vm2387_vm0, %v2386_v1  ;;  %1154 = vxpose.xlu0.c.b16.start.end [1/1] (short) (narrow) %v2632_v50, 16  ;;  %v2120_v37 = vcombine.low %v2632_v50, %v2632_v50 }
 0x582   :  { %v2645_v58 = vpop.permute.xlu1 %1135 }
 0x595   :  { %v1146_v59 = vpop.trf.xlu1 }
 0x596   :  { %v1206_v60 = vsel %vm206_vm2, %v1146_v59, 0 }
 0x597   :  { %2252 = vmatpush3.bf16.msra.mxu0 %v1206_v60 }
 0x598   :  { %2263 = vmatprep.subr.bf16.mxu0 %v2386_v1 }
 0x5e1   :  { %v1162_v63 = vpop.trf.xlu0 }
 0x5e2   :  { %v1252_v0 = vsel %vm206_vm2, %v1162_v63, 0  ;;  %v2122_v63 = vcombine.low %v2645_v58, %v2645_v58 }
 0x63e   :  { %v1041_v52 = vpop.f32.mrf.mxu0 }
 0x63f   :  { %v2638_v53 = vadd.f32 %v2107_v51, %v1041_v52 }
 0x640   :  { %v2241_v54 = vpop.f32.mrf.mxu0 }
 0x641   :  { %v1058_v55 = vpack.c.bf16 %v2638_v53, %v2638_v53 }
 0x642   :  { %v1044_v56 = vpop.f32.mrf.mxu0 }
 0x643   :  { %2248 = vmatmul.mubr.msk.bf16.vlgmr.msra.gmra.mxu1 %vm76_vm1, %v1058_v55 }
 0x644   :  { %v2242_v57 = vpop.f32.mrf.mxu0  ;;  %2259 = vmatprep.mubr.msk.bf16.mxu1 %vm2387_vm0, %v2386_v1  ;;  %2258 = vmatpush3.bf16.msra.mxu1 %v1252_v0  ;;  %v2121_v0 = vcombine.low %v2649_v61, %v2649_v61 }
 0x645   :  { %2269 = vmatprep.subr.bf16.mxu1 %v2386_v1 }
 0x703   :  { %v1114_v3 = vpop.f32.mrf.mxu1 }
 0x704   :  { %v1115_v4 = vadd.f32 %v2111_v2, %v1114_v3 }
 0x705   :  { %v2249_v7 = vpop.f32.mrf.mxu1 }
 0x706   :  { %v1120_v8 = vpack.c.bf16 %v1115_v4, %v1115_v4 }
 0x707   :  { %v1117_v9 = vpop.f32.mrf.mxu1 }
 0x708   :  { %1124 = vrot.lane.b32.xlu1 %v1120_v8, %s2390_s1  ;;  %1122 = vrot.lane.b32.xlu0 %v1120_v8, %s2388_s14 }
 0x709   :  { %2254 = vmatmul.mubr.msk.bf16.vlgmr.msra.gmra.mxu0 %vm202_vm3, %v1120_v8  ;;  %v2250_v10 = vpop.f32.mrf.mxu1 }
 0x70a   :  { %2265 = vmatprep.mubr.msk.bf16.mxu0 %vm2387_vm0, %v2386_v1 }
 0x70c   :  { %1126 = vrot.lane.b32.xlu0 %v1120_v8, %s2389_s3 }
 0x72a   :  { %1170 = vxpose.xlu0.c.b16.start.end [1/1] (short) (narrow) %v2649_v61, 16 }
 0x72b   :  { %1186 = vxpose.xlu1.c.b16.start.end [1/1] (short) (narrow) %v2645_v58, 16 }
 0x77a   :  { %v1123_v11 = vpop.permute.xlu0 %1122  ;;  %v1125_v13 = vpop.permute.xlu1 %1124 }
 0x77b   :  { %2260 = vmatmul.mubr.msk.bf16.vlgmr.msra.gmra.mxu1 %vm202_vm3, %v1123_v11 }
 0x77c   :  { %2271 = vmatprep.mubr.msk.bf16.mxu1 %vm2387_vm0, %v2386_v1 }
 0x77e   :  { %v1127_v12 = vpop.permute.xlu0 %1126 }
 0x78c   :  { %v1178_v6 = vpop.trf.xlu0 }
 0x78d   :  { %v1298_v14 = vsel %vm206_vm2, %v1178_v6, 0  ;;  %v1194_v15 = vpop.trf.xlu1 }
 0x78e   :  { %v1344_v17 = vsel %vm206_vm2, %v1194_v15, 0  ;;  %2264 = vmatpush3.bf16.msra.mxu0 %v1298_v14 }
 0x78f   :  { %2270 = vmatpush3.bf16.msra.mxu1 %v1344_v17  ;;  %2275 = vmatprep.subr.bf16.mxu0 %v2386_v1 }
 0x790   :  { %2281 = vmatprep.subr.bf16.mxu1 %v2386_v1 }
 0x791   :  { %2266 = vmatmul.mubr.msk.bf16.vlgmr.msra.gmra.mxu0 %vm202_vm3, %v1125_v13 }
 0x792   :  { %2272 = vmatmul.mubr.msk.bf16.vlgmr.msra.gmra.mxu1 %vm202_vm3, %v1127_v12  ;;  %2277 = vmatprep.mubr.msk.bf16.mxu0 %vm2387_vm0, %v2386_v1 }
 0x793   :  { %2283 = vmatprep.mubr.msk.bf16.mxu1 %vm2387_vm0, %v2386_v1 }
 0x7c9   :  { %v1242_v16 = vpop.f32.mrf.mxu0 }
 0x7ca   :  { %v1386_v18 = vsel %vm202_vm3, %v1242_v16, -inf }
 0x7cb   :  { %1387 = vmax.xlane.f32.xlu0 %v1386_v18  ;;  %v2255_v19 = vpop.f32.mrf.mxu0 }
 0x7cd   :  { %v1245_v20 = vpop.f32.mrf.mxu0 }
 0x7cf   :  { %v2256_v21 = vpop.f32.mrf.mxu0 }
 0x83b   :  { %v1288_v22 = vpop.f32.mrf.mxu1 }
 0x83c   :  { %v1389_v23 = vsel %vm202_vm3, %v1288_v22, -inf }
 0x83d   :  { %1390 = vmax.xlane.f32.xlu1 %v1389_v23  ;;  %v2261_v24 = vpop.f32.mrf.mxu1 }
 0x83f   :  { %v1291_v25 = vpop.f32.mrf.mxu1 }
 0x841   :  { %v2262_v26 = vpop.f32.mrf.mxu1 }
 0x851   :  { %v1334_v27 = vpop.f32.mrf.mxu0 }
 0x852   :  { %v1380_v28 = vpop.f32.mrf.mxu1  ;;  %v1392_v29 = vsel %vm202_vm3, %v1334_v27, -inf }
 0x853   :  { %1393 = vmax.xlane.f32.xlu0 %v1392_v29  ;;  %v2267_v30 = vpop.f32.mrf.mxu0  ;;  %v1395_v31 = vsel %vm202_vm3, %v1380_v28, -inf }
 0x854   :  { %1396 = vmax.xlane.f32.xlu1 %v1395_v31  ;;  %v2273_v32 = vpop.f32.mrf.mxu1  ;;  %v1388_v39 = vpop.xlane.xlu0 %1387 }
 0x855   :  { %v1337_v33 = vpop.f32.mrf.mxu0  ;;  %v1398_v40 = vsub.f32 %v1242_v16, %v1388_v39 }
 0x856   :  { %v1383_v34 = vpop.f32.mrf.mxu1 }
 0x857   :  { %v2268_v35 = vpop.f32.mrf.mxu0  ;;  %v1402_v41 = vmul.f32 1.442695, %v1398_v40 }
 0x858   :  { %v2274_v36 = vpop.f32.mrf.mxu1 }
 0x859   :  { %2346 = vpow2.f32 %v1402_v41 }
 0x865   :  { %1444 = vrot.lane.b32.xlu1 %v2120_v37, %s2391_s4 }
 0x866   :  { %v2347_v42 = vpop.eup %2346 }
 0x867   :  { %v1410_v43 = vsel %vm202_vm3, %v2347_v42, 0.0 }
 0x869   :  { %1442 = vrot.lane.b32.xlu0 %v2119_v38, %s2391_s4 }
 0x888   :  { %1411 = vadd.xlane.f32.xlu0 %v1410_v43 }
 0x8c6   :  { %v1391_v44 = vpop.xlane.xlu1 %1390 }
 0x8c7   :  { %v1399_v45 = vsub.f32 %v1288_v22, %v1391_v44 }
 0x8c9   :  { %v1404_v46 = vmul.f32 1.442695, %v1399_v45 }
 0x8cb   :  { %2348 = vpow2.f32 %v1404_v46 }
 0x8d8   :  { %v2349_v47 = vpop.eup %2348 }
 0x8d9   :  { %v1413_v48 = vsel %vm202_vm3, %v2349_v47, 0.0 }
 0x8da   :  { %1414 = vadd.xlane.f32.xlu1 %v1413_v48 }
 0x8dc   :  { %v1394_v50 = vpop.xlane.xlu0 %1393 }
 0x8dd   :  { %v1400_v49 = vsub.f32 %v1334_v27, %v1394_v50  ;;  %v1397_v51 = vpop.xlane.xlu1 %1396 }
 0x8de   :  { %v1401_v52 = vsub.f32 %v1380_v28, %v1397_v51 }
 0x8df   :  { %v1406_v54 = vmul.f32 1.442695, %v1400_v49 }
 0x8e0   :  { %v1408_v55 = vmul.f32 1.442695, %v1401_v52  ;;  %v1443_v2 = vpop.permute.xlu0 %1442 }
 0x8e1   :  { %2350 = vpow2.f32 %v1406_v54  ;;  %v1445_v9 = vpop.permute.xlu1 %1444 }
 0x8e2   :  { %2352 = vpow2.f32 %v1408_v55 }
 0x8ee   :  { %v2351_v56 = vpop.eup %2350 }
 0x8ef   :  { %v2353_v57 = vpop.eup %2352  ;;  %v1416_v59 = vsel %vm202_vm3, %v2351_v56, 0.0 }
 0x8f0   :  { %1417 = vadd.xlane.f32.xlu1 %v1416_v59  ;;  %v1419_v60 = vsel %vm202_vm3, %v2353_v57, 0.0 }
 0x8f1   :  { %1420 = vadd.xlane.f32.xlu0 %v1419_v60 }
 0x901   :  { %1448 = vrot.lane.b32.xlu1 %v2122_v63, %s2391_s4 }
 0x907   :  { %1446 = vrot.lane.b32.xlu0 %v2121_v0, %s2391_s4  ;;  %s2397_s4 = smov [#allocation2]  }
 0x908   :  { %s2081_s18 = sshll.u32 %s2397_s4, 4  ;;  %s2082_s18 = int_to_ptr.vmem [resolvable:$true] %s2081_s18 }
 0x909   :  { %s2364_s19 = scalar_lea.vmem %s2082_s18, 128  ;;  %p2369_p1 = scmp.lt.s32.totalorder %s2082_s18, %s2082_s18 }
 0x90a   :  { %p2365_p0 = scmp.ne.s32.totalorder %s2082_s18, %s2364_s19  ;;  %p2370_p2 = scmp.lt.s32.totalorder %s2364_s19, %s2364_s19 }
 0x90c   :  { %p2371_p3 = por %p2370_p2, %p2369_p1 }
 0x90e   :  { %p2372_p4 = pnand %p2371_p3, %p2365_p0 }
 0x911   :  { %v1412_v3 = vpop.xlane.xlu0 %1411 }
 0x912   :  { %2354 = vrcp.f32 %v1412_v3 }
 0x91f   :  { %v2355_v4 = vpop.eup %2354 }
 0x920   :  { %v1426_v7 = vmul.f32 %v2355_v4, %v2347_v42 }
 0x922   :  { %v1430_v8 = vpack.c.bf16 %v1426_v7, %v1426_v7 }
 0x924   :  { %v1522_v10 = vsel %vm202_vm3, %v1430_v8, 0  ;;  %1454 = vxpose.xlu1.c.b16.start.end [1/1] (short) (narrow) %v1443_v2, 16  ;;  %v2328_v2 = vld [vmem:[%s2769_s9 + $0x8] sm:$0xff]  }
 0x925   :  { %1470 = vxpose.xlu0.c.b16.start.end [1/1] (short) (narrow) %v1445_v9, 16  ;;  %2276 = vmatpush3.bf16.xpose.msra.mxu0 %v1522_v10 }
 0x926   :  { %2287 = vmatprep.subr.bf16.mxu0 %v2386_v1 }
 0x963   :  { %v1415_v58 = vpop.xlane.xlu1 %1414 }
 0x964   :  { %2356 = vrcp.f32 %v1415_v58 }
 0x971   :  { %v2357_v11 = vpop.eup %2356 }
 0x972   :  { %v1427_v61 = vmul.f32 %v2357_v11, %v2349_v47 }
 0x974   :  { %v1431_v12 = vpack.c.bf16 %v1427_v61, %v1427_v61  ;;  %v2329_v61 = vld [vmem:[%s2769_s9] sm:$0xff]  }
 0x976   :  { %v1568_v13 = vsel %vm202_vm3, %v1431_v12, 0 }
 0x977   :  { %2282 = vmatpush3.bf16.xpose.msra.mxu1 %v1568_v13 }
 0x978   :  { %2293 = vmatprep.subr.bf16.mxu1 %v2386_v1 }
 0x979   :  { %v1418_v6 = vpop.xlane.xlu1 %1417 }
 0x97a   :  { %2358 = vrcp.f32 %v1418_v6  ;;  %v1421_v14 = vpop.xlane.xlu0 %1420 }
 0x97b   :  { %2360 = vrcp.f32 %v1421_v14 }
 0x97d   :  { %v1449_v15 = vpop.permute.xlu1 %1448 }
 0x97e   :  { %1502 = vxpose.xlu1.c.b16.start.end [1/1] (short) (narrow) %v1449_v15, 16  ;;  %v1447_v17 = vpop.permute.xlu0 %1446 }
 0x97f   :  { %1486 = vxpose.xlu0.c.b16.start.end [1/1] (short) (narrow) %v1447_v17, 16 }
 0x986   :  { %v1462_v16 = vpop.trf.xlu1 }
 0x987   :  { %v2359_v18 = vpop.eup %2358  ;;  %2278 = vmatmul.mubr.msk.bf16.vlgmr.msra.gmra.mxu0 %vm202_vm3, %v1462_v16  ;;  %v1478_v19 = vpop.trf.xlu0 }
 0x988   :  { %v2361_v20 = vpop.eup %2360  ;;  %v1428_v21 = vmul.f32 %v2359_v18, %v2351_v56  ;;  %2284 = vmatmul.mubr.msk.bf16.vlgmr.msra.gmra.mxu1 %vm202_vm3, %v1478_v19  ;;  %2289 = vmatprep.mubr.msk.bf16.mxu0 %vm2387_vm0, %v2386_v1 }
 0x989   :  { %v1429_v22 = vmul.f32 %v2361_v20, %v2353_v57  ;;  %2295 = vmatprep.mubr.msk.bf16.mxu1 %vm2387_vm0, %v2386_v1 }
 0x98a   :  { %v1432_v23 = vpack.c.bf16 %v1428_v21, %v1428_v21 }
 0x98b   :  { %v1433_v24 = vpack.c.bf16 %v1429_v22, %v1429_v22 }
 0x98c   :  { %v1614_v25 = vsel %vm202_vm3, %v1432_v23, 0 }
 0x98d   :  { %2288 = vmatpush3.bf16.xpose.msra.mxu0 %v1614_v25  ;;  %v1660_v26 = vsel %vm202_vm3, %v1433_v24, 0 }
 0x98e   :  { %2294 = vmatpush3.bf16.xpose.msra.mxu1 %v1660_v26  ;;  %2299 = vmatprep.subr.bf16.mxu0 %v2386_v1 }
 0x9e0   :  { %v1510_v27 = vpop.trf.xlu1 }
 0x9e1   :  { %v1494_v28 = vpop.trf.xlu0  ;;  %2296 = vmatmul.mubr.msk.bf16.vlgmr.msra.gmra.mxu1 %vm202_vm3, %v1510_v27 }
 0x9e2   :  { %2290 = vmatmul.mubr.msk.bf16.vlgmr.msra.gmra.mxu0 %vm202_vm3, %v1494_v28 }
 0x9e3   :  { %2303 = vmatprep.mubr.msk.bf16.mxu0 %vm2387_vm0, %v2386_v1  ;;  %2300 = vmatpush3.bf16.msra.mxu0 %v2328_v2 }
 0x9e4   :  { %2301 = vmatprep.subr.bf16.mxu0 %v2386_v1 }
 0x9e7   :  { %2302 = vmatpush3.bf16.msra.mxu0 %v2329_v61 }
 0xa47   :  { %v1558_v29 = vpop.f32.mrf.mxu0 }
 0xa48   :  { %v1604_v30 = vpop.f32.mrf.mxu1  ;;  %1702 = vxpose.xlu0.b32.start.end [1/1] (short) (narrow) %v1558_v29, 8 }
 0xa49   :  { %v2279_v31 = vpop.f32.mrf.mxu0  ;;  %1734 = vxpose.xlu1.b32.start.end [1/1] (short) (narrow) %v1604_v30, 8 }
 0xa4a   :  { %v2285_v32 = vpop.f32.mrf.mxu1  ;;  %v2129_v31 = vld [vmem:[%s2770_s10] ss:$0 sm:$0xff] }
 0xa4b   :  { %v1561_v33 = vpop.f32.mrf.mxu0 }
 0xa4c   :  { %v1607_v34 = vpop.f32.mrf.mxu1 }
 0xa4d   :  { %v2280_v35 = vpop.f32.mrf.mxu0 }
 0xa4e   :  { %v2286_v36 = vpop.f32.mrf.mxu1 }
 0xaa1   :  { %v1696_v37 = vpop.f32.mrf.mxu1 }
 0xaa2   :  { %v1650_v38 = vpop.f32.mrf.mxu0 }
 0xaa3   :  { %1766 = vxpose.xlu0.b32.start.end [1/1] (short) (narrow) %v1650_v38, 8  ;;  %v2297_v39 = vpop.f32.mrf.mxu1 }
 0xaa4   :  { %v2291_v40 = vpop.f32.mrf.mxu0 }
 0xaa5   :  { %v1699_v41 = vpop.f32.mrf.mxu1 }
 0xaa6   :  { %v1653_v42 = vpop.f32.mrf.mxu0 }
 0xaa7   :  { %1798 = vxpose.xlu0.b32.start.end [1/1] (short) (narrow) %v1696_v37, 8  ;;  %v2298_v43 = vpop.f32.mrf.mxu1 }
 0xaa8   :  { %v2292_v44 = vpop.f32.mrf.mxu0 }
 0xac4   :  { %v1718_v45 = vpop.trf.xlu0 }
 0xac5   :  { %v1750_v47 = vpop.trf.xlu1 }
 0xb1f   :  { %v1782_v46 = vpop.trf.xlu0 }
 0xb20   :  { %v1830_v48 = vcombine.low %v1718_v45, %v1782_v46  ;;  %v1831_v50 = vcombine.high %v1718_v45, %v1782_v46 }
 0xb22   :  { %v1838_v54 = vrot.slane %v1830_v48, %v2575_v62  ;;  %v1845_v55 = vrot.slane %v1831_v50, %v2575_v62  ;;  %v2134_v50 = vld [vmem:[%s2772_s12] ss:$0 sm:$0xff] }
 0xb23   :  { %v1814_v49 = vpop.trf.xlu0 }
 0xb24   :  { %v1846_v51 = vcombine.low %v1750_v47, %v1814_v49  ;;  %v1847_v52 = vcombine.high %v1750_v47, %v1814_v49 }
 0xb26   :  { %v1854_v56 = vrot.slane %v1846_v51, %v2575_v62  ;;  %v1861_v57 = vrot.slane %v1847_v52, %v2575_v62 }
 0xb28   :  { %v1862_v59 = vcombine.low %v1838_v54, %v1854_v56  ;;  %v1863_v60 = vcombine.high %v1838_v54, %v1854_v56  ;;  %v1878_v63 = vcombine.low %v1845_v55, %v1861_v57  ;;  %v1879_v0 = vcombine.high %v1845_v55, %v1861_v57 }
 0xb2a   :  { %v1870_v3 = vrot.slane %v1862_v59, %v2577_v5  ;;  %v1877_v4 = vrot.slane %v1863_v60, %v2577_v5  ;;  %v1886_v7 = vrot.slane %v1878_v63, %v2577_v5  ;;  %v1893_v8 = vrot.slane %v1879_v0, %v2577_v5 }
 0xb2c   :  { %v1898_v9 = vcombine.low %v1870_v3, %v1877_v4  ;;  %v2127_v10 = vcombine.high %v1870_v3, %v1877_v4  ;;  %v1914_v58 = vcombine.low %v1886_v7, %v1893_v8  ;;  %v2128_v11 = vcombine.high %v1886_v7, %v1893_v8 }
 0xb2e   :  { %v1905_v12 = vrot.slane %v1898_v9, %v2575_v62  ;;  %v1913_v13 = vrot.slane %v2127_v10, %v2575_v62  ;;  %v1921_v6 = vrot.slane %v1914_v58, %v2575_v62  ;;  %v1929_v14 = vrot.slane %v2128_v11, %v2575_v62 }
 0xb30   :  { %v1931_v15 = vcombine.high %v1905_v12, %v1913_v13  ;;  %v1947_v17 = vcombine.high %v1921_v6, %v1929_v14  ;;  %v1930_v1 = vcombine.low %v1905_v12, %v1913_v13  ;;  %v1946_v16 = vcombine.low %v1921_v6, %v1929_v14 }
 0xb32   :  { %v1945_v18 = vrot.slane %v1931_v15, %v2577_v5  ;;  %v1961_v19 = vrot.slane %v1947_v17, %v2577_v5  ;;  %v1938_v20 = vrot.slane %v1930_v1, %v2577_v5  ;;  %v1954_v21 = vrot.slane %v1946_v16, %v2577_v5 }
 0xb34   :  { %v1964_v22 = vcombine.low %v1945_v18, %v1961_v19  ;;  %v1963_v23 = vcombine.high %v1938_v20, %v1954_v21  ;;  %v1962_v24 = vcombine.low %v1938_v20, %v1954_v21  ;;  %v1965_v62 = vcombine.high %v1945_v18, %v1961_v19 }
 0xb36   :  { %1971 = vrot.lane.b32.xlu0 %v1964_v22, %s2394_s5  ;;  %1967 = vrot.lane.b32.xlu1 %v1963_v23, %s2395_s24 }
 0xb3a   :  { %1975 = vrot.lane.b32.xlu1 %v1965_v62, %s2396_s25 }
 0xba8   :  { %v1968_v25 = vpop.permute.xlu1 %1967  ;;  %v1972_v26 = vpop.permute.xlu0 %1971 }
 0xba9   :  { %v1978_v27 = vsel %vm202_vm3, %v1962_v24, %v1968_v25 }
 0xbaa   :  { %v1979_v29 = vsel %vm981_vm4, %v1978_v27, %v1972_v26 }
 0xbac   :  { %v1976_v28 = vpop.permute.xlu1 %1975 }
 0xbad   :  { %v1980_v30 = vsel %vm983_vm5, %v1979_v29, %v1976_v28 }
 0xbae   :  { %v1981_v5 = vpack.c.bf16 %v1980_v30, %v1980_v30 }
 0xbb0   :  { %2304 = vmatmul.mubr.msk.bf16.vlgmr.msra.gmra.mxu0 %vm76_vm1, %v1981_v5 }
 0xc70   :  { %v2037_v32 = vpop.f32.mrf.mxu0 }
 0xc71   :  { %v2038_v33 = vadd.f32 %v2129_v31, %v2037_v32 }
 0xc72   :  { %v2305_v34 = vpop.f32.mrf.mxu0 }
 0xc73   :  { %v2043_v35 = vadd.f32 %v2038_v33, %v2638_v53  ;;  %v2133_v53 = vld [vmem:[%s2771_s11] ss:$0 sm:$0xff] }
 0xc74   :  { %v2040_v36 = vpop.f32.mrf.mxu0 }
 0xc75   :  { %v2044_v37 = vsel %vm76_vm1, %v2043_v35, 0.0 }
 0xc76   :  { %2045 = vadd.xlane.f32.xlu1 %v2044_v37  ;;  %v2306_v38 = vpop.f32.mrf.mxu0 }
 0xcff   :  { %v2046_v39 = vpop.xlane.xlu1 %2045 }
 0xd00   :  { %v2048_v40 = vmul.f32 0.03125, %v2046_v39 }
 0xd02   :  { %v2049_v41 = vsub.f32 %v2043_v35, %v2048_v40 }
 0xd04   :  { %v2050_v42 = vmul.f32 %v2049_v41, %v2049_v41 }
 0xd06   :  { %v2051_v43 = vsel %vm76_vm1, %v2050_v42, 0.0 }
 0xd07   :  { %2052 = vadd.xlane.f32.xlu0 %v2051_v43 }
 0xd90   :  { %v2053_v44 = vpop.xlane.xlu0 %2052 }
 0xd91   :  { %v2054_v45 = vmul.f32 0.03125, %v2053_v44 }
 0xd93   :  { %v2055_v46 = vadd.f32 1e-05, %v2054_v45 }
 0xd95   :  { %2362 = vrsqrt.f32 %v2055_v46 }
 0xda2   :  { %v2363_v47 = vpop.eup %2362 }
 0xda3   :  { %v2057_v48 = vmul.f32 %v2363_v47, %v2049_v41 }
 0xda5   :  { %v2065_v49 = vmul.f32 %v2133_v53, %v2057_v48 }
 0xda7   :  { %v2073_v51 = vadd.f32 %v2134_v50, %v2065_v49 }
 0xda9   :  { %2074 = vst.msk [vmem:[#allocation2] sm:$0xff] %vm76_vm1, %v2073_v51 }
 0xdaa   :  { %2375 = shalt.err (!%p2372_p4)
}
 0xdab   :  { %2084 = dma.vmem_to_hbm [thread:$0]  %s2082_s18, 128, %s2773_s13, [#allocation3]  }
 0xdac   :  { %2384 = dma.done.wait [#allocation3], 128  }
 0xdad   :  { %2385 = vsyncadd [#allocation3], 4294967168 }
 0xdae   :  { %2088 = vsyncpa [#allocation3], 1 }

</bundles_post_ra>
